<compile_context>
chip_gen: v7x
topology: tpu7x:2x2x1
jax: 0.10.0
libtpu: 0.0.40
codegen_flags: <defaults>
</compile_context>

<pallas_src>
import jax
import jax.numpy as jnp
from jax.experimental import pallas as pl
from jax.experimental.pallas import tpu as pltpu


def autoencoder_kernel(x_ref,
                       w1_ref, b1_ref,   # encoder fc1: (D, H) bf16, (1, H) f32
                       w2_ref, b2_ref,   # encoder fc2: (H, Zp) bf16, (1, Zp) f32
                       w3_ref, b3_ref,   # decoder fc1: (Zp, H) bf16, (1, H) f32
                       w4_ref, b4_ref,   # decoder fc2: (H, D) bf16, (1, D) f32
                       out_ref):
    x = x_ref[...]                                   # (TB, D) bf16

    # --- encoder ---
    h1 = jnp.dot(x, w1_ref[...], preferred_element_type=jnp.float32) + b1_ref[...]
    h1 = jnp.maximum(h1, 0.0).astype(jnp.bfloat16)
    z = jnp.dot(h1, w2_ref[...], preferred_element_type=jnp.float32) + b2_ref[...]
    z = z.astype(jnp.bfloat16)

    # --- decoder ---
    h2 = jnp.dot(z, w3_ref[...], preferred_element_type=jnp.float32) + b3_ref[...]
    h2 = jnp.maximum(h2, 0.0).astype(jnp.bfloat16)
    x_recon = jnp.dot(h2, w4_ref[...], preferred_element_type=jnp.float32) + b4_ref[...]

    out_ref[...] = x_recon.astype(out_ref.dtype)


def autoencoder_forward(x_nchw, params, *, max_batch_tile=128):
    """Forward pass: x (B, C, H, W) float32 -> x_recon (B, C, H, W) float32."""
    B, C, H, W = x_nchw.shape
    D = C * H * W

    (w1, b1), (w2, b2), (w3, b3), (w4, b4) = params
    Hdim = w1.shape[1]
    Zp = w2.shape[1]          # padded latent (multiple of 128)

    x_flat = x_nchw.reshape(B, D).astype(jnp.bfloat16)

    # Batch tile: multiple of 16 (bf16 sublane packing), capped at max_batch_tile.
    TB = min(max_batch_tile, max(16, ((B + 15) // 16) * 16))
    Bp = ((B + TB - 1) // TB) * TB
    if Bp != B:
        x_flat = jnp.pad(x_flat, ((0, Bp - B), (0, 0)))

    grid = (Bp // TB,)

    # Cost estimate (4 matmuls) + bytes moved.
    flops = 2 * Bp * (D * Hdim + Hdim * Zp + Zp * Hdim + Hdim * D)
    weight_bytes = 2 * (D * Hdim + Hdim * Zp + Zp * Hdim + Hdim * D)   # bf16
    bias_bytes = 4 * (Hdim + Zp + Hdim + D)                            # f32
    act_bytes = Bp * D * 2 + Bp * D * 4                                # bf16 in, f32 out
    cost = pl.CostEstimate(flops=flops, transcendentals=0,
                           bytes_accessed=weight_bytes + bias_bytes + act_bytes)

    # Weights/biases: constant index_map -> resident in VMEM across batch tiles.
    resident = lambda shape: pl.BlockSpec(shape, lambda i: (0,) * len(shape))

    out_flat = pl.pallas_call(
        autoencoder_kernel,
        out_shape=jax.ShapeDtypeStruct((Bp, D), jnp.float32),
        grid_spec=pltpu.PrefetchScalarGridSpec(
            num_scalar_prefetch=0,
            grid=grid,
            in_specs=[
                pl.BlockSpec((TB, D), lambda i: (i, 0)),   # x: iterates over batch tiles
                resident(w1.shape), resident(b1.shape),
                resident(w2.shape), resident(b2.shape),
                resident(w3.shape), resident(b3.shape),
                resident(w4.shape), resident(b4.shape),
            ],
            out_specs=pl.BlockSpec((TB, D), lambda i: (i, 0)),
        ),
        compiler_params=pltpu.CompilerParams(
            dimension_semantics=("parallel",),   # v7x: split batch tiles across 2 TCs
            vmem_limit_bytes=32 << 20,           # realistic budget (weights ~1 MiB bf16)
        ),
        cost_estimate=cost,
    )(x_flat, w1, b1, w2, b2, w3, b3, w4, b4)

    return out_flat[:B].reshape(B, C, H, W)


def encode_features(x_nchw, params):
    """Equivalent of AutoEncoder.feature_array (encoder output, flattened)."""
    B = x_nchw.shape[0]
    D = x_nchw.size // B
    (w1, b1), (w2, b2), _, _ = params
    xf = x_nchw.reshape(B, D).astype(jnp.bfloat16)
    h1 = jnp.maximum(
        jnp.dot(xf, w1, preferred_element_type=jnp.float32) + b1, 0.0
    ).astype(jnp.bfloat16)
    z = jnp.dot(h1, w2, preferred_element_type=jnp.float32) + b2
    return z  # (B, Zp); true latent occupies the first `latent` columns


def mse_loss_sum(x_recon, x):
    """Equivalent of F.mse_loss(x_recon, x, reduction='sum')."""
    return jnp.sum((x_recon - x) ** 2)


def init_params(key, D, hidden, latent):
    """nn.Linear-style uniform fan-in init; bf16 weights, f32 biases.

    The latent dim is zero-padded to a multiple of 128 lanes so the two
    latent matmuls use full-lane (unmasked) vector stores; the padding is
    mathematically exact (extra w2 cols / b2 entries / w3 rows are zero).
    """
    def linear(k, fan_in, fan_out):
        k_w, k_b = jax.random.split(k)
        bound = 1.0 / jnp.sqrt(fan_in)
        w = jax.random.uniform(k_w, (fan_in, fan_out), jnp.float32, -bound, bound)
        b = jax.random.uniform(k_b, (1, fan_out), jnp.float32, -bound, bound)
        return w, b

    k1, k2, k3, k4 = jax.random.split(key, 4)
    w1, b1 = linear(k1, D, hidden)        # encoder fc1
    w2, b2 = linear(k2, hidden, latent)   # encoder fc2
    w3, b3 = linear(k3, latent, hidden)   # decoder fc1
    w4, b4 = linear(k4, hidden, D)        # decoder fc2

    Zp = ((latent + 127) // 128) * 128
    pad = Zp - latent
    if pad:
        w2 = jnp.pad(w2, ((0, 0), (0, pad)))
        b2 = jnp.pad(b2, ((0, 0), (0, pad)))
        w3 = jnp.pad(w3, ((0, pad), (0, 0)))

    bf16 = jnp.bfloat16
    return (
        (w1.astype(bf16), b1),
        (w2.astype(bf16), b2),
        (w3.astype(bf16), b3),
        (w4.astype(bf16), b4),
    )


if __name__ == "__main__":
    key = jax.random.PRNGKey(0)
    k_x, k_p = jax.random.split(key)

    B, C, H, W = 2, 4, 16, 16
    D = C * H * W               # 1024
    hidden, latent = 256, 32    # latent is padded to 128 internally

    x = jax.random.normal(k_x, (B, C, H, W), jnp.float32)
    params = init_params(k_p, D, hidden, latent)

    x_recon = autoencoder_forward(x, params)
    x_recon = jax.block_until_ready(x_recon)
    assert x_recon.shape == x.shape, (x_recon.shape, x.shape)

    # pure-JAX reference with the identical bf16/f32 precision path
    (w1, b1), (w2, b2), (w3, b3), (w4, b4) = params
    xf = x.reshape(B, D).astype(jnp.bfloat16)
    h1 = jnp.maximum(
        jnp.dot(xf, w1, preferred_element_type=jnp.float32) + b1, 0.0
    ).astype(jnp.bfloat16)
    z = (jnp.dot(h1, w2, preferred_element_type=jnp.float32) + b2).astype(jnp.bfloat16)
    h2 = jnp.maximum(
        jnp.dot(z, w3, preferred_element_type=jnp.float32) + b3, 0.0
    ).astype(jnp.bfloat16)
    ref = (jnp.dot(h2, w4, preferred_element_type=jnp.float32) + b4).reshape(B, C, H, W)
    assert jnp.allclose(x_recon, ref, atol=1e-2, rtol=1e-2), float(
        jnp.max(jnp.abs(x_recon - ref)))

    _ = jax.block_until_ready(mse_loss_sum(x_recon, x))
    _ = jax.block_until_ready(encode_features(x, params))

    print("KERNEL_OK")
</pallas_src>

<mosaic_0001>
module attributes {stable_mosaic.version = 11 : i64} {
  func.func @autoencoder_kernel(%arg0: i32, %arg1: memref<16x1024xbf16, #tpu.memory_space<vmem>>, %arg2: memref<1024x256xbf16, #tpu.memory_space<vmem>>, %arg3: memref<1x256xf32, #tpu.memory_space<vmem>>, %arg4: memref<256x128xbf16, #tpu.memory_space<vmem>>, %arg5: memref<1x128xf32, #tpu.memory_space<vmem>>, %arg6: memref<128x256xbf16, #tpu.memory_space<vmem>>, %arg7: memref<1x256xf32, #tpu.memory_space<vmem>>, %arg8: memref<256x1024xbf16, #tpu.memory_space<vmem>>, %arg9: memref<1x1024xf32, #tpu.memory_space<vmem>>, %arg10: memref<16x1024xf32, #tpu.memory_space<vmem>>) attributes {dimension_semantics = [#tpu.dimension_semantics<parallel>], iteration_bounds = array<i64: 1>, scalar_prefetch = 0 : i64, scratch_operands = 0 : i64, tpu.core_type = #tpu.core_type<tc>, window_params = [{transform_indices = @transform_0, window_bounds = array<i64: 16, 1024>}, {pipeline_mode = #tpu.pipeline_mode<synchronous>, transform_indices = @transform_1, window_bounds = array<i64: 1024, 256>}, {pipeline_mode = #tpu.pipeline_mode<synchronous>, transform_indices = @transform_2, window_bounds = array<i64: 1, 256>}, {pipeline_mode = #tpu.pipeline_mode<synchronous>, transform_indices = @transform_3, window_bounds = array<i64: 256, 128>}, {pipeline_mode = #tpu.pipeline_mode<synchronous>, transform_indices = @transform_4, window_bounds = array<i64: 1, 128>}, {pipeline_mode = #tpu.pipeline_mode<synchronous>, transform_indices = @transform_5, window_bounds = array<i64: 128, 256>}, {pipeline_mode = #tpu.pipeline_mode<synchronous>, transform_indices = @transform_6, window_bounds = array<i64: 1, 256>}, {pipeline_mode = #tpu.pipeline_mode<synchronous>, transform_indices = @transform_7, window_bounds = array<i64: 256, 1024>}, {pipeline_mode = #tpu.pipeline_mode<synchronous>, transform_indices = @transform_8, window_bounds = array<i64: 1, 1024>}, {transform_indices = @transform_9, window_bounds = array<i64: 16, 1024>}]} {
    %c0 = arith.constant 0 : index
    %c0_0 = arith.constant 0 : index
    %0 = vector.load %arg1[%c0, %c0_0] : memref<16x1024xbf16, #tpu.memory_space<vmem>>, vector<16x1024xbf16>
    %c0_1 = arith.constant 0 : index
    %c0_2 = arith.constant 0 : index
    %1 = vector.load %arg2[%c0_1, %c0_2] : memref<1024x256xbf16, #tpu.memory_space<vmem>>, vector<1024x256xbf16>
    %cst = arith.constant dense<0.000000e+00> : vector<16x256xf32>
    %2 = tpu.matmul %0, %1, %cst {dimension_numbers = #tpu.dot_dimension_numbers<[1], [0], [0], [1], [0, 0, 1, 1], [], []>} : vector<16x1024xbf16>, vector<1024x256xbf16>, vector<16x256xf32> -> vector<16x256xf32>
    %c0_3 = arith.constant 0 : index
    %c0_4 = arith.constant 0 : index
    %3 = vector.load %arg3[%c0_3, %c0_4] : memref<1x256xf32, #tpu.memory_space<vmem>>, vector<1x256xf32>
    %4 = vector.broadcast %3 : vector<1x256xf32> to vector<16x256xf32>
    %5 = arith.addf %2, %4 : vector<16x256xf32>
    %cst_5 = arith.constant 0.000000e+00 : f32
    %6 = vector.broadcast %cst_5 : f32 to vector<16x256xf32>
    %7 = arith.maximumf %5, %6 : vector<16x256xf32>
    %8 = arith.truncf %7 : vector<16x256xf32> to vector<16x256xbf16>
    %c0_6 = arith.constant 0 : index
    %c0_7 = arith.constant 0 : index
    %9 = vector.load %arg4[%c0_6, %c0_7] : memref<256x128xbf16, #tpu.memory_space<vmem>>, vector<256x128xbf16>
    %cst_8 = arith.constant dense<0.000000e+00> : vector<16x128xf32>
    %10 = tpu.matmul %8, %9, %cst_8 {dimension_numbers = #tpu.dot_dimension_numbers<[1], [0], [0], [1], [0, 0, 1, 1], [], []>} : vector<16x256xbf16>, vector<256x128xbf16>, vector<16x128xf32> -> vector<16x128xf32>
    %c0_9 = arith.constant 0 : index
    %c0_10 = arith.constant 0 : index
    %11 = vector.load %arg5[%c0_9, %c0_10] : memref<1x128xf32, #tpu.memory_space<vmem>>, vector<1x128xf32>
    %12 = vector.broadcast %11 : vector<1x128xf32> to vector<16x128xf32>
    %13 = arith.addf %10, %12 : vector<16x128xf32>
    %14 = arith.truncf %13 : vector<16x128xf32> to vector<16x128xbf16>
    %c0_11 = arith.constant 0 : index
    %c0_12 = arith.constant 0 : index
    %15 = vector.load %arg6[%c0_11, %c0_12] : memref<128x256xbf16, #tpu.memory_space<vmem>>, vector<128x256xbf16>
    %cst_13 = arith.constant dense<0.000000e+00> : vector<16x256xf32>
    %16 = tpu.matmul %14, %15, %cst_13 {dimension_numbers = #tpu.dot_dimension_numbers<[1], [0], [0], [1], [0, 0, 1, 1], [], []>} : vector<16x128xbf16>, vector<128x256xbf16>, vector<16x256xf32> -> vector<16x256xf32>
    %c0_14 = arith.constant 0 : index
    %c0_15 = arith.constant 0 : index
    %17 = vector.load %arg7[%c0_14, %c0_15] : memref<1x256xf32, #tpu.memory_space<vmem>>, vector<1x256xf32>
    %18 = vector.broadcast %17 : vector<1x256xf32> to vector<16x256xf32>
    %19 = arith.addf %16, %18 : vector<16x256xf32>
    %cst_16 = arith.constant 0.000000e+00 : f32
    %20 = vector.broadcast %cst_16 : f32 to vector<16x256xf32>
    %21 = arith.maximumf %19, %20 : vector<16x256xf32>
    %22 = arith.truncf %21 : vector<16x256xf32> to vector<16x256xbf16>
    %c0_17 = arith.constant 0 : index
    %c0_18 = arith.constant 0 : index
    %23 = vector.load %arg8[%c0_17, %c0_18] : memref<256x1024xbf16, #tpu.memory_space<vmem>>, vector<256x1024xbf16>
    %cst_19 = arith.constant dense<0.000000e+00> : vector<16x1024xf32>
    %24 = tpu.matmul %22, %23, %cst_19 {dimension_numbers = #tpu.dot_dimension_numbers<[1], [0], [0], [1], [0, 0, 1, 1], [], []>} : vector<16x256xbf16>, vector<256x1024xbf16>, vector<16x1024xf32> -> vector<16x1024xf32>
    %c0_20 = arith.constant 0 : index
    %c0_21 = arith.constant 0 : index
    %25 = vector.load %arg9[%c0_20, %c0_21] : memref<1x1024xf32, #tpu.memory_space<vmem>>, vector<1x1024xf32>
    %26 = vector.broadcast %25 : vector<1x1024xf32> to vector<16x1024xf32>
    %27 = arith.addf %24, %26 : vector<16x1024xf32>
    %c0_22 = arith.constant 0 : index
    %c0_23 = arith.constant 0 : index
    %28 = vector.load %arg10[%c0_22, %c0_23] : memref<16x1024xf32, #tpu.memory_space<vmem>>, vector<16x1024xf32>
    tpu.vector_store %arg10[%c0_22, %c0_23], %27 {strides = array<i32>} : memref<16x1024xf32, #tpu.memory_space<vmem>>, vector<16x1024xf32>,
    return
  }
  func.func @transform_0(%arg0: i32) -> (i32, i32) {
    %c0_i32 = arith.constant 0 : i32
    %c0_i32_0 = arith.constant 0 : i32
    return %arg0, %c0_i32 : i32, i32
  }
  func.func @transform_1(%arg0: i32) -> (i32, i32) {
    %c0_i32 = arith.constant 0 : i32
    %c0_i32_0 = arith.constant 0 : i32
    %c0_i32_1 = arith.constant 0 : i32
    return %c0_i32, %c0_i32_0 : i32, i32
  }
  func.func @transform_2(%arg0: i32) -> (i32, i32) {
    %c0_i32 = arith.constant 0 : i32
    %c0_i32_0 = arith.constant 0 : i32
    %c0_i32_1 = arith.constant 0 : i32
    return %c0_i32, %c0_i32_0 : i32, i32
  }
  func.func @transform_3(%arg0: i32) -> (i32, i32) {
    %c0_i32 = arith.constant 0 : i32
    %c0_i32_0 = arith.constant 0 : i32
    %c0_i32_1 = arith.constant 0 : i32
    return %c0_i32, %c0_i32_0 : i32, i32
  }
  func.func @transform_4(%arg0: i32) -> (i32, i32) {
    %c0_i32 = arith.constant 0 : i32
    %c0_i32_0 = arith.constant 0 : i32
    %c0_i32_1 = arith.constant 0 : i32
    return %c0_i32, %c0_i32_0 : i32, i32
  }
  func.func @transform_5(%arg0: i32) -> (i32, i32) {
    %c0_i32 = arith.constant 0 : i32
    %c0_i32_0 = arith.constant 0 : i32
    %c0_i32_1 = arith.constant 0 : i32
    return %c0_i32, %c0_i32_0 : i32, i32
  }
  func.func @transform_6(%arg0: i32) -> (i32, i32) {
    %c0_i32 = arith.constant 0 : i32
    %c0_i32_0 = arith.constant 0 : i32
    %c0_i32_1 = arith.constant 0 : i32
    return %c0_i32, %c0_i32_0 : i32, i32
  }
  func.func @transform_7(%arg0: i32) -> (i32, i32) {
    %c0_i32 = arith.constant 0 : i32
    %c0_i32_0 = arith.constant 0 : i32
    %c0_i32_1 = arith.constant 0 : i32
    return %c0_i32, %c0_i32_0 : i32, i32
  }
  func.func @transform_8(%arg0: i32) -> (i32, i32) {
    %c0_i32 = arith.constant 0 : i32
    %c0_i32_0 = arith.constant 0 : i32
    %c0_i32_1 = arith.constant 0 : i32
    return %c0_i32, %c0_i32_0 : i32, i32
  }
  func.func @transform_9(%arg0: i32) -> (i32, i32) {
    %c0_i32 = arith.constant 0 : i32
    %c0_i32_0 = arith.constant 0 : i32
    return %arg0, %c0_i32 : i32, i32
  }
}

</mosaic_0001>

<bundles_post_ra>
// kernel: tpu_custom_call.1
= control target key start
LH: loop header
LB: loop body
LE: loop exit
PB: predicated region body
PF: predicated region fallthrough
CT: control target
= control target key end

     0   :  { %14 = vsyncpa [#allocation3], 0  ;;  %s3404_s0 = inlined_call_operand.hbm [shape: bf16[16,1024], index: 0, kind: input, shape index: {}]   ;;  %s3405_s1 = inlined_call_operand.hbm [shape: bf16[1024,256], index: 1, kind: input, shape index: {}]   ;;  %s3406_s2 = inlined_call_operand.vmem [shape: f32[1,256], index: 2, kind: input, shape index: {}]   ;;  %s3407_s3 = inlined_call_operand.hbm [shape: bf16[256,128], index: 3, kind: input, shape index: {}]   ;;  %s3408_s4 = inlined_call_operand.vmem [shape: f32[1,128], index: 4, kind: input, shape index: {}]   ;;  %s3409_s5 = inlined_call_operand.hbm [shape: bf16[128,256], index: 5, kind: input, shape index: {}]   ;;  %s3410_s6 = inlined_call_operand.vmem [shape: f32[1,256], index: 6, kind: input, shape index: {}]   ;;  %s3411_s7 = inlined_call_operand.hbm [shape: bf16[256,1024], index: 7, kind: input, shape index: {}]   ;;  %s3412_s8 = inlined_call_operand.vmem [shape: f32[1,1024], index: 8, kind: input, shape index: {}]   ;;  %s3413_s9 = inlined_call_operand.hbm [shape: f32[16,1024], index: 9, kind: output, shape index: {}]  }
   0x1   :  { %15 = vsyncpa [#allocation6], 0 }
   0x2   :  { %16 = vsyncpa [#allocation9], 0 }
   0x3   :  { %17 = vsyncpa [#allocation4], 0  ;;  %s3180_s30 = smov [#allocation5]   ;;  %s3040_s13 = scalar_lea.hbm %s3405_s1, 16384 }
   0x4   :  { %s35_s10 = sshll.u32 %s3180_s30, 4  ;;  %p3041_p0 = scmp.ne.s32.totalorder %s3405_s1, %s3040_s13  ;;  %s36_s10 = int_to_ptr.vmem [resolvable:$true] %s35_s10 }
   0x5   :  { %p3044_p1 = scmp.lt.u32.totalorder %s3040_s13, %s3405_s1 }
   0x7   :  { %p3046_p2 = pnand %p3044_p1, %p3041_p0 }
   0x9   :  { %3049 = shalt.err (!%p3046_p2)
}
   0xa   :  { %s3050_s18 = scalar_lea.vmem %s36_s10, 16384  ;;  %p3055_p4 = scmp.lt.s32.totalorder %s36_s10, %s36_s10 }
   0xb   :  { %p3051_p3 = scmp.ne.s32.totalorder %s36_s10, %s3050_s18  ;;  %p3056_p5 = scmp.lt.s32.totalorder %s3050_s18, %s3050_s18 }
   0xd   :  { %p3057_p6 = por %p3056_p5, %p3055_p4 }
   0xf   :  { %p3058_p7 = pnand %p3057_p6, %p3051_p3 }
  0x11   :  { %3061 = shalt.err (!%p3058_p7)
}
  0x12   :  { %s3181_s19 = smov 128   ;;  %s3182_s20 = smov 8  }
  0x13   :  { %41 = dma.hbm_to_vmem [thread:$0]  %s3405_s1, 16384, %s36_s10, [#allocation6], %s3181_s19, %s3181_s19, %s3182_s20  }
  0x14   :  { %s3183_s23 = smov [#allocation8]   ;;  %s3184_s25 = smov [#allocation2]  }
  0x15   :  { %s63_s24 = sshll.u32 %s3183_s23, 4  ;;  %s23_s26 = sshll.u32 %s3184_s25, 4  ;;  %s64_s24 = int_to_ptr.vmem [resolvable:$true] %s63_s24  ;;  %s24_s26 = int_to_ptr.vmem [resolvable:$true] %s23_s26 }
  0x16   :  { %s3062_s29 = scalar_lea.hbm %s3409_s5, 2048 }
  0x17   :  { %p3063_p8 = scmp.ne.s32.totalorder %s3409_s5, %s3062_s29  ;;  %p3066_p9 = scmp.lt.u32.totalorder %s3062_s29, %s3409_s5 }
  0x19   :  { %p3068_p10 = pnand %p3066_p9, %p3063_p8 }
  0x1b   :  { %3071 = shalt.err (!%p3068_p10)
}
  0x1c   :  { %s3072_s1 = scalar_lea.vmem %s64_s24, 2048  ;;  %p3077_p12 = scmp.lt.s32.totalorder %s64_s24, %s64_s24 }
  0x1d   :  { %p3073_p11 = scmp.ne.s32.totalorder %s64_s24, %s3072_s1  ;;  %p3078_p13 = scmp.lt.s32.totalorder %s3072_s1, %s3072_s1 }
  0x1f   :  { %p3079_p0 = por %p3078_p13, %p3077_p12 }
  0x21   :  { %p3080_p1 = pnand %p3079_p0, %p3073_p11 }
  0x23   :  { %3083 = shalt.err (!%p3080_p1)
}
  0x24   :  { %69 = dma.hbm_to_vmem [thread:$0]  %s3409_s5, 2048, %s64_s24, [#allocation9], %s3181_s19, %s3181_s19, %s3182_s20  }
  0x25   :  { %s3084_s17 = scalar_lea.hbm %s3404_s0, 1024 }
  0x26   :  { %p3085_p2 = scmp.ne.s32.totalorder %s3404_s0, %s3084_s17  ;;  %p3088_p3 = scmp.lt.u32.totalorder %s3084_s17, %s3404_s0 }
  0x28   :  { %p3090_p4 = pnand %p3088_p3, %p3085_p2 }
  0x2a   :  { %3093 = shalt.err (!%p3090_p4)
}
  0x2b   :  { %s3094_s25 = scalar_lea.vmem %s24_s26, 1024  ;;  %p3099_p6 = scmp.lt.s32.totalorder %s24_s26, %s24_s26 }
  0x2c   :  { %p3095_p5 = scmp.ne.s32.totalorder %s24_s26, %s3094_s25  ;;  %p3100_p7 = scmp.lt.s32.totalorder %s3094_s25, %s3094_s25 }
  0x2e   :  { %p3101_p8 = por %p3100_p7, %p3099_p6 }
  0x30   :  { %p3102_p9 = pnand %p3101_p8, %p3095_p5 }
  0x32   :  { %3105 = shalt.err (!%p3102_p9)
}
  0x33   :  { %s3185_s5 = smov 512   ;;  %s3186_s19 = smov 32  }
  0x34   :  { %29 = dma.hbm_to_vmem [thread:$0]  %s3404_s0, 1024, %s24_s26, [#allocation3], %s3185_s5, %s3185_s5, %s3186_s19  }
  0x35   :  { %s3187_s27 = smov [#allocation7]   ;;  %s3106_s11 = scalar_lea.hbm %s3407_s3, 2048 }
  0x36   :  { %s49_s28 = sshll.u32 %s3187_s27, 4  ;;  %p3107_p10 = scmp.ne.s32.totalorder %s3407_s3, %s3106_s11  ;;  %s50_s28 = int_to_ptr.vmem [resolvable:$true] %s49_s28 }
  0x37   :  { %p3110_p11 = scmp.lt.u32.totalorder %s3106_s11, %s3407_s3 }
  0x39   :  { %p3112_p12 = pnand %p3110_p11, %p3107_p10 }
  0x3b   :  { %3115 = shalt.err (!%p3112_p12)
}
  0x3c   :  { %s3116_s14 = scalar_lea.vmem %s50_s28, 2048  ;;  %p3121_p0 = scmp.lt.s32.totalorder %s50_s28, %s50_s28 }
  0x3d   :  { %p3117_p13 = scmp.ne.s32.totalorder %s50_s28, %s3116_s14  ;;  %p3122_p1 = scmp.lt.s32.totalorder %s3116_s14, %s3116_s14 }
  0x3f   :  { %p3123_p2 = por %p3122_p1, %p3121_p0 }
  0x41   :  { %p3124_p3 = pnand %p3123_p2, %p3117_p13 }
  0x43   :  { %3127 = shalt.err (!%p3124_p3)
}
  0x44   :  { %s3188_s0 = smov 64   ;;  %s3189_s26 = smov 4  }
  0x45   :  { %55 = dma.hbm_to_vmem [thread:$0]  %s3407_s3, 2048, %s50_s28, [#allocation6], %s3188_s0, %s3188_s0, %s3189_s26  }
  0x46   :  { %s3190_s17 = smov [#allocation10]   ;;  %s3128_s23 = scalar_lea.hbm %s3411_s7, 16384 }
  0x47   :  { %s77_s18 = sshll.u32 %s3190_s17, 4  ;;  %p3129_p4 = scmp.ne.s32.totalorder %s3411_s7, %s3128_s23  ;;  %s78_s18 = int_to_ptr.vmem [resolvable:$true] %s77_s18 }
  0x48   :  { %p3132_p5 = scmp.lt.u32.totalorder %s3128_s23, %s3411_s7 }
  0x4a   :  { %p3134_p6 = pnand %p3132_p5, %p3129_p4 }
  0x4c   :  { %3137 = shalt.err (!%p3134_p6)
}
  0x4d   :  { %s3138_s29 = scalar_lea.vmem %s78_s18, 16384  ;;  %p3143_p8 = scmp.lt.s32.totalorder %s78_s18, %s78_s18 }
  0x4e   :  { %p3139_p7 = scmp.ne.s32.totalorder %s78_s18, %s3138_s29  ;;  %p3144_p9 = scmp.lt.s32.totalorder %s3138_s29, %s3138_s29 }
  0x50   :  { %p3145_p10 = por %p3144_p9, %p3143_p8 }
  0x52   :  { %p3146_p11 = pnand %p3145_p10, %p3139_p7 }
  0x54   :  { %3149 = shalt.err (!%p3146_p11)
}
  0x55   :  { %83 = dma.hbm_to_vmem [thread:$0]  %s3411_s7, 16384, %s78_s18, [#allocation9], %s3185_s5, %s3185_s5, %s3186_s19  }
  0x56   :  { %3172 = dma.done.wait [#allocation3], 1024  }
  0x57   :  { %3173 = vsyncadd [#allocation3], 4294966272 }
  0x58   :  { %3174 = dma.done.wait [#allocation6], 18432  }
  0x59   :  { %3175 = vsyncadd [#allocation6], 4294948864 }
  0x5a   :  { %3176 = dma.done.wait [#allocation9], 18432  }
  0x5b   :  { %3177 = vsyncadd [#allocation9], 4294948864  ;;  %v2808_v0 = vld [vmem:[#allocation5 + $0x4] ss:$8 sps:$4 sm:$0xff]   ;;  %v2810_v1 = vld [vmem:[#allocation5] ss:$8 sps:$4 sm:$0xff]  }
  0x5c   :  { %930 = vmatprep.subr.bf16.mxu0 %v2808_v0  ;;  %v2811_v2 = vld [vmem:[#allocation5 + $0x14] ss:$8 sps:$4 sm:$0xff]   ;;  %v2813_v3 = vld [vmem:[#allocation5 + $0x10] ss:$8 sps:$4 sm:$0xff]   ;;  %v2814_v4 = vld [vmem:[#allocation5 + $0x24] ss:$8 sps:$4 sm:$0xff]  }
  0x5d   :  { %931 = vmatpush1.bf16.msra.mxu0 %v2810_v1  ;;  %v2816_v5 = vld [vmem:[#allocation5 + $0x20] ss:$8 sps:$4 sm:$0xff]   ;;  %v2817_v6 = vld [vmem:[#allocation5 + $0x34] ss:$8 sps:$4 sm:$0xff]   ;;  %v2819_v7 = vld [vmem:[#allocation5 + $0x30] ss:$8 sps:$4 sm:$0xff]  }
  0x5e   :  { %932 = vmatprep.subr.bf16.mxu0 %v2811_v2  ;;  %v2820_v8 = vld [vmem:[#allocation5 + $0x44] ss:$8 sps:$4 sm:$0xff]   ;;  %v2822_v9 = vld [vmem:[#allocation5 + $0x40] ss:$8 sps:$4 sm:$0xff]   ;;  %v2823_v10 = vld [vmem:[#allocation5 + $0x54] ss:$8 sps:$4 sm:$0xff]  }
  0x5f   :  { %v2825_v11 = vld [vmem:[#allocation5 + $0x50] ss:$8 sps:$4 sm:$0xff]   ;;  %v2826_v12 = vld [vmem:[#allocation5 + $0x64] ss:$8 sps:$4 sm:$0xff]   ;;  %v2828_v16 = vld [vmem:[#allocation5 + $0x60] ss:$8 sps:$4 sm:$0xff]  }
  0x60   :  { %v102_v13 = vld [vmem:[#allocation2] sm:$0xff]  ;;  %v2829_v17 = vld [vmem:[#allocation5 + $0x74] ss:$8 sps:$4 sm:$0xff]   ;;  %v2831_v18 = vld [vmem:[#allocation5 + $0x70] ss:$8 sps:$4 sm:$0xff]  }
  0x61   :  { %933 = vmatpush1.bf16.msra.mxu0 %v2813_v3  ;;  %v106_v14 = vld [vmem:[#allocation2 + $0x20] sm:$0xff]  ;;  %v2835_v21 = vld [vmem:[#allocation5 + $0x94] ss:$8 sps:$4 sm:$0xff]   ;;  %v2837_v22 = vld [vmem:[#allocation5 + $0x90] ss:$8 sps:$4 sm:$0xff]  }
  0x62   :  { %934 = vmatprep.subr.bf16.mxu0 %v2814_v4  ;;  %v2460_v15 = vcombine.high %v102_v13, %v106_v14  ;;  %v2832_v19 = vld [vmem:[#allocation5 + $0x84] ss:$8 sps:$4 sm:$0xff]   ;;  %v2834_v20 = vld [vmem:[#allocation5 + $0x80] ss:$8 sps:$4 sm:$0xff]   ;;  %v2841_v25 = vld [vmem:[#allocation5 + $0xb4] ss:$8 sps:$4 sm:$0xff]   ;;  %v2459_v38 = vcombine.low %v102_v13, %v106_v14 }
  0x63   :  { %v2838_v23 = vld [vmem:[#allocation5 + $0xa4] ss:$8 sps:$4 sm:$0xff]   ;;  %v2840_v24 = vld [vmem:[#allocation5 + $0xa0] ss:$8 sps:$4 sm:$0xff]   ;;  %v2843_v26 = vld [vmem:[#allocation5 + $0xb0] ss:$8 sps:$4 sm:$0xff]  }
  0x64   :  { %962 = vmatprep.mubr.bf16.mxu0 %v2460_v15  ;;  %v2844_v27 = vld [vmem:[#allocation5 + $0xc4] ss:$8 sps:$4 sm:$0xff]   ;;  %v2846_v28 = vld [vmem:[#allocation5 + $0xc0] ss:$8 sps:$4 sm:$0xff]   ;;  %v2847_v29 = vld [vmem:[#allocation5 + $0xd4] ss:$8 sps:$4 sm:$0xff]  }
  0x65   :  { %935 = vmatpush1.bf16.msra.mxu0 %v2816_v5  ;;  %v2849_v30 = vld [vmem:[#allocation5 + $0xd0] ss:$8 sps:$4 sm:$0xff]   ;;  %v2850_v31 = vld [vmem:[#allocation5 + $0xe4] ss:$8 sps:$4 sm:$0xff]   ;;  %v2852_v32 = vld [vmem:[#allocation5 + $0xe0] ss:$8 sps:$4 sm:$0xff]  }
  0x66   :  { %936 = vmatprep.subr.bf16.mxu0 %v2817_v6  ;;  %v2853_v33 = vld [vmem:[#allocation5 + $0xf4] ss:$8 sps:$4 sm:$0xff]   ;;  %v2855_v34 = vld [vmem:[#allocation5 + $0xf0] ss:$8 sps:$4 sm:$0xff]   ;;  %v2858_v35 = vld [vmem:[#allocation5 + $0x104] ss:$8 sps:$4 sm:$0xff]  }
  0x67   :  { %v3312_v36 = vld [vmem:[#allocation2 + $0x8] sm:$0xff]  ;;  %v2861_v41 = vld [vmem:[#allocation5 + $0x114] ss:$8 sps:$4 sm:$0xff]   ;;  %v2859_v42 = vld [vmem:[#allocation5 + $0x110] ss:$8 sps:$4 sm:$0xff]  }
  0x68   :  { %v3314_v37 = vld [vmem:[#allocation2 + $0x28] sm:$0xff]  ;;  %v2867_v45 = vld [vmem:[#allocation5 + $0x134] ss:$8 sps:$4 sm:$0xff]   ;;  %v2865_v46 = vld [vmem:[#allocation5 + $0x130] ss:$8 sps:$4 sm:$0xff]  }
  0x69   :  { %937 = vmatpush1.bf16.msra.mxu0 %v2819_v7  ;;  %v2856_v39 = vld [vmem:[#allocation5 + $0x100] ss:$8 sps:$4 sm:$0xff]   ;;  %v2462_v40 = vcombine.high %v3312_v36, %v3314_v37  ;;  %v2864_v43 = vld [vmem:[#allocation5 + $0x124] ss:$8 sps:$4 sm:$0xff]   ;;  %v2873_v49 = vld [vmem:[#allocation5 + $0x154] ss:$8 sps:$4 sm:$0xff]  }
  0x6a   :  { %938 = vmatprep.subr.bf16.mxu0 %v2820_v8  ;;  %v2862_v44 = vld [vmem:[#allocation5 + $0x120] ss:$8 sps:$4 sm:$0xff]   ;;  %v2870_v47 = vld [vmem:[#allocation5 + $0x144] ss:$8 sps:$4 sm:$0xff]   ;;  %v2871_v50 = vld [vmem:[#allocation5 + $0x150] ss:$8 sps:$4 sm:$0xff]  }
  0x6b   :  { %v2868_v48 = vld [vmem:[#allocation5 + $0x140] ss:$8 sps:$4 sm:$0xff]   ;;  %v2876_v51 = vld [vmem:[#allocation5 + $0x164] ss:$8 sps:$4 sm:$0xff]   ;;  %v2879_v53 = vld [vmem:[#allocation5 + $0x174] ss:$8 sps:$4 sm:$0xff]  }
  0x6c   :  { %v2874_v52 = vld [vmem:[#allocation5 + $0x160] ss:$8 sps:$4 sm:$0xff]   ;;  %v2877_v54 = vld [vmem:[#allocation5 + $0x170] ss:$8 sps:$4 sm:$0xff]   ;;  %v2882_v55 = vld [vmem:[#allocation5 + $0x184] ss:$8 sps:$4 sm:$0xff]  }
  0x6d   :  { %939 = vmatpush1.bf16.msra.mxu0 %v2822_v9  ;;  %v2880_v56 = vld [vmem:[#allocation5 + $0x180] ss:$8 sps:$4 sm:$0xff]   ;;  %v2885_v57 = vld [vmem:[#allocation5 + $0x194] ss:$8 sps:$4 sm:$0xff]   ;;  %v2883_v58 = vld [vmem:[#allocation5 + $0x190] ss:$8 sps:$4 sm:$0xff]  }
  0x6e   :  { %940 = vmatprep.subr.bf16.mxu0 %v2823_v10  ;;  %v2888_v59 = vld [vmem:[#allocation5 + $0x1a4] ss:$8 sps:$4 sm:$0xff]   ;;  %v2886_v60 = vld [vmem:[#allocation5 + $0x1a0] ss:$8 sps:$4 sm:$0xff]   ;;  %v2891_v61 = vld [vmem:[#allocation5 + $0x1b4] ss:$8 sps:$4 sm:$0xff]   ;;  %v2461_v10 = vcombine.low %v3312_v36, %v3314_v37 }
  0x6f   :  { %v2889_v62 = vld [vmem:[#allocation5 + $0x1b0] ss:$8 sps:$4 sm:$0xff]   ;;  %v2894_v63 = vld [vmem:[#allocation5 + $0x1c4] ss:$8 sps:$4 sm:$0xff]   ;;  %v2892_v0 = vld [vmem:[#allocation5 + $0x1c0] ss:$8 sps:$4 sm:$0xff]  }
  0x70   :  { %v2897_v1 = vld [vmem:[#allocation5 + $0x1d4] ss:$8 sps:$4 sm:$0xff]   ;;  %v2895_v2 = vld [vmem:[#allocation5 + $0x1d0] ss:$8 sps:$4 sm:$0xff]   ;;  %v2900_v3 = vld [vmem:[#allocation5 + $0x1e4] ss:$8 sps:$4 sm:$0xff]  }
  0x71   :  { %941 = vmatpush1.bf16.msra.mxu0 %v2825_v11  ;;  %v2898_v4 = vld [vmem:[#allocation5 + $0x1e0] ss:$8 sps:$4 sm:$0xff]   ;;  %v2903_v5 = vld [vmem:[#allocation5 + $0x1f4] ss:$8 sps:$4 sm:$0xff]   ;;  %v2901_v6 = vld [vmem:[#allocation5 + $0x1f0] ss:$8 sps:$4 sm:$0xff]  }
  0x72   :  { %942 = vmatprep.subr.bf16.mxu0 %v2826_v12  ;;  %v2906_v7 = vld [vmem:[#allocation5 + $0x204] ss:$8 sps:$4 sm:$0xff]   ;;  %v3318_v8 = vld [vmem:[#allocation2 + $0x10] sm:$0xff]  ;;  %v2904_v11 = vld [vmem:[#allocation5 + $0x200] ss:$8 sps:$4 sm:$0xff]  }
  0x73   :  { %v3320_v9 = vld [vmem:[#allocation2 + $0x30] sm:$0xff]  ;;  %v3000_v14 = vld [vmem:[#allocation7 + $0x40] sm:$0xff]  }
  0x74   :  { %v2464_v12 = vcombine.high %v3318_v8, %v3320_v9  ;;  %v2909_v13 = vld [vmem:[#allocation5 + $0x214] ss:$8 sps:$4 sm:$0xff]   ;;  %v3001_v15 = vld [vmem:[#allocation7] sm:$0xff]   ;;  %2756 = vmatprep.subr.bf16.mxu1 %v3000_v14  ;;  %v2925_v37 = vld [vmem:[#allocation5 + $0x270] ss:$8 sps:$4 sm:$0xff]  }
  0x75   :  { %943 = vmatpush1.bf16.msra.mxu0 %v2828_v16  ;;  %v3002_v16 = vld [vmem:[#allocation7 + $0x48] sm:$0xff]   ;;  %2757 = vmatpush3.bf16.msra.mxu1 %v3001_v15  ;;  %v2927_v36 = vld [vmem:[#allocation5 + $0x274] ss:$8 sps:$4 sm:$0xff]  }
  0x76   :  { %944 = vmatprep.subr.bf16.mxu0 %v2829_v17  ;;  %v2907_v17 = vld [vmem:[#allocation5 + $0x210] ss:$8 sps:$4 sm:$0xff]   ;;  %2758 = vmatprep.subr.bf16.mxu1 %v3002_v16  ;;  %v2984_v14 = vld [vmem:[#allocation5 + $0x3a4] ss:$8 sps:$4 sm:$0xff]   ;;  %v2982_v15 = vld [vmem:[#allocation5 + $0x3a0] ss:$8 sps:$4 sm:$0xff]  }
  0x77   :  { %v2987_v16 = vld [vmem:[#allocation5 + $0x3b4] ss:$8 sps:$4 sm:$0xff]  }
  0x79   :  { %945 = vmatpush1.bf16.msra.mxu0 %v2831_v18  ;;  %v2912_v18 = vld [vmem:[#allocation5 + $0x224] ss:$8 sps:$4 sm:$0xff]  }
  0x7a   :  { %946 = vmatprep.subr.bf16.mxu0 %v2832_v19  ;;  %v3003_v19 = vld [vmem:[#allocation7 + $0x8] sm:$0xff]  }
  0x7b   :  { %2759 = vmatpush3.bf16.msra.mxu1 %v3003_v19  ;;  %v2988_v19 = vld [vmem:[#allocation5 + $0x3c0] ss:$8 sps:$4 sm:$0xff]  }
  0x7d   :  { %947 = vmatpush1.bf16.msra.mxu0 %v2834_v20  ;;  %v3004_v20 = vld [vmem:[#allocation7 + $0x50] sm:$0xff]  }
  0x7e   :  { %948 = vmatprep.subr.bf16.mxu0 %v2835_v21  ;;  %v2910_v21 = vld [vmem:[#allocation5 + $0x220] ss:$8 sps:$4 sm:$0xff]   ;;  %2760 = vmatprep.subr.bf16.mxu1 %v3004_v20  ;;  %v2993_v20 = vld [vmem:[#allocation5 + $0x3d4] ss:$8 sps:$4 sm:$0xff]  }
  0x81   :  { %949 = vmatpush1.bf16.msra.mxu0 %v2837_v22  ;;  %v2915_v22 = vld [vmem:[#allocation5 + $0x234] ss:$8 sps:$4 sm:$0xff]  }
  0x82   :  { %950 = vmatprep.subr.bf16.mxu0 %v2838_v23  ;;  %v3005_v23 = vld [vmem:[#allocation7 + $0x10] sm:$0xff]  }
  0x83   :  { %2761 = vmatpush3.bf16.msra.mxu1 %v3005_v23  ;;  %v2994_v23 = vld [vmem:[#allocation5 + $0x3e0] ss:$8 sps:$4 sm:$0xff]  }
  0x85   :  { %951 = vmatpush1.bf16.msra.mxu0 %v2840_v24  ;;  %v3006_v24 = vld [vmem:[#allocation7 + $0x58] sm:$0xff]  }
  0x86   :  { %952 = vmatprep.subr.bf16.mxu0 %v2841_v25  ;;  %v2913_v25 = vld [vmem:[#allocation5 + $0x230] ss:$8 sps:$4 sm:$0xff]   ;;  %2762 = vmatprep.subr.bf16.mxu1 %v3006_v24  ;;  %v2999_v24 = vld [vmem:[#allocation5 + $0x3f4] ss:$8 sps:$4 sm:$0xff]  }
  0x89   :  { %953 = vmatpush1.bf16.msra.mxu0 %v2843_v26  ;;  %v2918_v26 = vld [vmem:[#allocation5 + $0x244] ss:$8 sps:$4 sm:$0xff]  }
  0x8a   :  { %954 = vmatprep.subr.bf16.mxu0 %v2844_v27  ;;  %v3007_v27 = vld [vmem:[#allocation7 + $0x18] sm:$0xff]  }
  0x8b   :  { %2763 = vmatpush3.bf16.msra.mxu1 %v3007_v27  ;;  %v3011_v27 = vld [vmem:[#allocation7 + $0x28] sm:$0xff]  }
  0x8d   :  { %955 = vmatpush1.bf16.msra.mxu0 %v2846_v28  ;;  %v3008_v28 = vld [vmem:[#allocation7 + $0x60] sm:$0xff]  }
  0x8e   :  { %956 = vmatprep.subr.bf16.mxu0 %v2847_v29  ;;  %v2916_v29 = vld [vmem:[#allocation5 + $0x240] ss:$8 sps:$4 sm:$0xff]   ;;  %2764 = vmatprep.subr.bf16.mxu1 %v3008_v28  ;;  %v3012_v28 = vld [vmem:[#allocation7 + $0x70] sm:$0xff]  }
  0x91   :  { %957 = vmatpush1.bf16.msra.mxu0 %v2849_v30  ;;  %v2921_v30 = vld [vmem:[#allocation5 + $0x254] ss:$8 sps:$4 sm:$0xff]  }
  0x92   :  { %958 = vmatprep.subr.bf16.mxu0 %v2850_v31  ;;  %v3009_v31 = vld [vmem:[#allocation7 + $0x20] sm:$0xff]  }
  0x93   :  { %2765 = vmatpush3.bf16.msra.mxu1 %v3009_v31  ;;  %v3015_v31 = vld [vmem:[#allocation7 + $0x38] sm:$0xff]  }
  0x95   :  { %959 = vmatpush1.bf16.msra.mxu0 %v2852_v32  ;;  %v3010_v32 = vld [vmem:[#allocation7 + $0x68] sm:$0xff]  }
  0x96   :  { %960 = vmatprep.subr.bf16.mxu0 %v2853_v33  ;;  %v2919_v33 = vld [vmem:[#allocation5 + $0x250] ss:$8 sps:$4 sm:$0xff]   ;;  %2766 = vmatprep.subr.bf16.mxu1 %v3010_v32  ;;  %v3018_v32 = vld [vmem:[#allocation8 + $0x4] ss:$8 sps:$4 sm:$0xff]  }
  0x97   :  { %2767 = vmatpush3.bf16.msra.mxu1 %v3011_v27  ;;  %v1481_v27 = vld [vmem:[#allocation10 + $0x138] sm:$0xff] }
  0x98   :  { %2768 = vmatprep.subr.bf16.mxu1 %v3012_v28 }
  0x99   :  { %961 = vmatpush1.bf16.msra.mxu0 %v2855_v34  ;;  %v2924_v34 = vld [vmem:[#allocation5 + $0x264] ss:$8 sps:$4 sm:$0xff]  }
  0x9a   :  { %973 = vmatprep.subr.bf16.mxu0 %v2858_v35  ;;  %v2922_v35 = vld [vmem:[#allocation5 + $0x260] ss:$8 sps:$4 sm:$0xff]  }
  0x9c   :  { %963 = vmatmul.mubr.bf16.vlgmr.msra.gmra.mrb[0].mxu0 %v2459_v38  ;;  %v2930_v38 = vld [vmem:[#allocation5 + $0x284] ss:$8 sps:$4 sm:$0xff]  }
  0x9d   :  { %974 = vmatpush1.bf16.msra.mxu0 %v2856_v39  ;;  %1005 = vmatprep.mubr.bf16.mxu0 %v2462_v40  ;;  %v2928_v39 = vld [vmem:[#allocation5 + $0x280] ss:$8 sps:$4 sm:$0xff]   ;;  %v2933_v40 = vld [vmem:[#allocation5 + $0x294] ss:$8 sps:$4 sm:$0xff]  }
  0x9e   :  { %975 = vmatprep.subr.bf16.mxu0 %v2861_v41  ;;  %v2931_v41 = vld [vmem:[#allocation5 + $0x290] ss:$8 sps:$4 sm:$0xff]  }
  0xa1   :  { %976 = vmatpush1.bf16.msra.mxu0 %v2859_v42  ;;  %v2936_v42 = vld [vmem:[#allocation5 + $0x2a4] ss:$8 sps:$4 sm:$0xff]  }
  0xa2   :  { %977 = vmatprep.subr.bf16.mxu0 %v2864_v43  ;;  %v2934_v43 = vld [vmem:[#allocation5 + $0x2a0] ss:$8 sps:$4 sm:$0xff]  }
  0xa5   :  { %978 = vmatpush1.bf16.msra.mxu0 %v2862_v44  ;;  %v2939_v44 = vld [vmem:[#allocation5 + $0x2b4] ss:$8 sps:$4 sm:$0xff]  }
  0xa6   :  { %979 = vmatprep.subr.bf16.mxu0 %v2867_v45  ;;  %v2937_v45 = vld [vmem:[#allocation5 + $0x2b0] ss:$8 sps:$4 sm:$0xff]  }
  0xa9   :  { %980 = vmatpush1.bf16.msra.mxu0 %v2865_v46  ;;  %v2942_v46 = vld [vmem:[#allocation5 + $0x2c4] ss:$8 sps:$4 sm:$0xff]  }
  0xaa   :  { %981 = vmatprep.subr.bf16.mxu0 %v2870_v47  ;;  %v2940_v47 = vld [vmem:[#allocation5 + $0x2c0] ss:$8 sps:$4 sm:$0xff]  }
  0xad   :  { %982 = vmatpush1.bf16.msra.mxu0 %v2868_v48  ;;  %v2945_v48 = vld [vmem:[#allocation5 + $0x2d4] ss:$8 sps:$4 sm:$0xff]  }
  0xae   :  { %983 = vmatprep.subr.bf16.mxu0 %v2873_v49  ;;  %v2943_v49 = vld [vmem:[#allocation5 + $0x2d0] ss:$8 sps:$4 sm:$0xff]  }
  0xb1   :  { %984 = vmatpush1.bf16.msra.mxu0 %v2871_v50  ;;  %v2948_v50 = vld [vmem:[#allocation5 + $0x2e4] ss:$8 sps:$4 sm:$0xff]  }
  0xb2   :  { %985 = vmatprep.subr.bf16.mxu0 %v2876_v51  ;;  %v2946_v51 = vld [vmem:[#allocation5 + $0x2e0] ss:$8 sps:$4 sm:$0xff]  }
  0xb5   :  { %986 = vmatpush1.bf16.msra.mxu0 %v2874_v52  ;;  %v2951_v52 = vld [vmem:[#allocation5 + $0x2f4] ss:$8 sps:$4 sm:$0xff]  }
  0xb6   :  { %987 = vmatprep.subr.bf16.mxu0 %v2879_v53  ;;  %v2949_v53 = vld [vmem:[#allocation5 + $0x2f0] ss:$8 sps:$4 sm:$0xff]  }
  0xb9   :  { %988 = vmatpush1.bf16.msra.mxu0 %v2877_v54  ;;  %v2954_v54 = vld [vmem:[#allocation5 + $0x304] ss:$8 sps:$4 sm:$0xff]  }
  0xba   :  { %989 = vmatprep.subr.bf16.mxu0 %v2882_v55  ;;  %v3326_v55 = vld [vmem:[#allocation2 + $0x18] sm:$0xff] }
  0xbd   :  { %990 = vmatpush1.bf16.msra.mxu0 %v2880_v56  ;;  %v3328_v56 = vld [vmem:[#allocation2 + $0x38] sm:$0xff] }
  0xbe   :  { %991 = vmatprep.subr.bf16.mxu0 %v2885_v57  ;;  %v2463_v57 = vcombine.low %v3318_v8, %v3320_v9  ;;  %v2975_v8 = vld [vmem:[#allocation5 + $0x374] ss:$8 sps:$4 sm:$0xff]   ;;  %v2973_v9 = vld [vmem:[#allocation5 + $0x370] ss:$8 sps:$4 sm:$0xff]  }
  0xc1   :  { %992 = vmatpush1.bf16.msra.mxu0 %v2883_v58  ;;  %v2952_v58 = vld [vmem:[#allocation5 + $0x300] ss:$8 sps:$4 sm:$0xff]  }
  0xc2   :  { %993 = vmatprep.subr.bf16.mxu0 %v2888_v59  ;;  %v2466_v59 = vcombine.high %v3326_v55, %v3328_v56 }
  0xc5   :  { %994 = vmatpush1.bf16.msra.mxu0 %v2886_v60  ;;  %v2957_v60 = vld [vmem:[#allocation5 + $0x314] ss:$8 sps:$4 sm:$0xff]  }
  0xc6   :  { %995 = vmatprep.subr.bf16.mxu0 %v2891_v61  ;;  %v2955_v61 = vld [vmem:[#allocation5 + $0x310] ss:$8 sps:$4 sm:$0xff]  }
  0xc9   :  { %996 = vmatpush1.bf16.msra.mxu0 %v2889_v62  ;;  %v2960_v62 = vld [vmem:[#allocation5 + $0x324] ss:$8 sps:$4 sm:$0xff]  }
  0xca   :  { %997 = vmatprep.subr.bf16.mxu0 %v2894_v63  ;;  %v2958_v63 = vld [vmem:[#allocation5 + $0x320] ss:$8 sps:$4 sm:$0xff]  }
  0xcd   :  { %998 = vmatpush1.bf16.msra.mxu0 %v2892_v0  ;;  %v2963_v0 = vld [vmem:[#allocation5 + $0x334] ss:$8 sps:$4 sm:$0xff]  }
  0xce   :  { %999 = vmatprep.subr.bf16.mxu0 %v2897_v1  ;;  %v2961_v1 = vld [vmem:[#allocation5 + $0x330] ss:$8 sps:$4 sm:$0xff]  }
  0xd1   :  { %1000 = vmatpush1.bf16.msra.mxu0 %v2895_v2  ;;  %v2966_v2 = vld [vmem:[#allocation5 + $0x344] ss:$8 sps:$4 sm:$0xff]  }
  0xd2   :  { %1001 = vmatprep.subr.bf16.mxu0 %v2900_v3  ;;  %v2964_v3 = vld [vmem:[#allocation5 + $0x340] ss:$8 sps:$4 sm:$0xff]  }
  0xd5   :  { %1002 = vmatpush1.bf16.msra.mxu0 %v2898_v4  ;;  %v2969_v4 = vld [vmem:[#allocation5 + $0x354] ss:$8 sps:$4 sm:$0xff]  }
  0xd6   :  { %1003 = vmatprep.subr.bf16.mxu0 %v2903_v5  ;;  %v2967_v5 = vld [vmem:[#allocation5 + $0x350] ss:$8 sps:$4 sm:$0xff]  }
  0xd9   :  { %1004 = vmatpush1.bf16.msra.mxu0 %v2901_v6  ;;  %v2972_v6 = vld [vmem:[#allocation5 + $0x364] ss:$8 sps:$4 sm:$0xff]  }
  0xda   :  { %1016 = vmatprep.subr.bf16.mxu0 %v2906_v7  ;;  %v2970_v7 = vld [vmem:[#allocation5 + $0x360] ss:$8 sps:$4 sm:$0xff]  }
  0xdc   :  { %1006 = vmatmul.mubr.bf16.vlgmr.msra.gmra.mrb[0].mxu0 %v2461_v10  ;;  %v2978_v10 = vld [vmem:[#allocation5 + $0x384] ss:$8 sps:$4 sm:$0xff]  }
  0xdd   :  { %1017 = vmatpush1.bf16.msra.mxu0 %v2904_v11  ;;  %1048 = vmatprep.mubr.bf16.mxu0 %v2464_v12  ;;  %v2976_v11 = vld [vmem:[#allocation5 + $0x380] ss:$8 sps:$4 sm:$0xff]   ;;  %v2981_v12 = vld [vmem:[#allocation5 + $0x394] ss:$8 sps:$4 sm:$0xff]  }
  0xde   :  { %1018 = vmatprep.subr.bf16.mxu0 %v2909_v13  ;;  %v2979_v13 = vld [vmem:[#allocation5 + $0x390] ss:$8 sps:$4 sm:$0xff]  }
  0xe1   :  { %1019 = vmatpush1.bf16.msra.mxu0 %v2907_v17  ;;  %v2985_v17 = vld [vmem:[#allocation5 + $0x3b0] ss:$8 sps:$4 sm:$0xff]  }
  0xe2   :  { %1020 = vmatprep.subr.bf16.mxu0 %v2912_v18  ;;  %v2990_v18 = vld [vmem:[#allocation5 + $0x3c4] ss:$8 sps:$4 sm:$0xff]  }
  0xe5   :  { %1021 = vmatpush1.bf16.msra.mxu0 %v2910_v21  ;;  %v2991_v21 = vld [vmem:[#allocation5 + $0x3d0] ss:$8 sps:$4 sm:$0xff]  }
  0xe6   :  { %1022 = vmatprep.subr.bf16.mxu0 %v2915_v22  ;;  %v2996_v22 = vld [vmem:[#allocation5 + $0x3e4] ss:$8 sps:$4 sm:$0xff]  }
  0xe9   :  { %1023 = vmatpush1.bf16.msra.mxu0 %v2913_v25  ;;  %v2997_v25 = vld [vmem:[#allocation5 + $0x3f0] ss:$8 sps:$4 sm:$0xff]  }
  0xea   :  { %1024 = vmatprep.subr.bf16.mxu0 %v2918_v26  ;;  %v2465_v26 = vcombine.low %v3326_v55, %v3328_v56  ;;  %v3021_v55 = vld [vmem:[#allocation8 + $0x14] ss:$8 sps:$4 sm:$0xff]   ;;  %v3019_v56 = vld [vmem:[#allocation8 + $0x10] ss:$8 sps:$4 sm:$0xff]  }
  0xed   :  { %1025 = vmatpush1.bf16.msra.mxu0 %v2916_v29  ;;  %v3013_v29 = vld [vmem:[#allocation7 + $0x30] sm:$0xff]  }
  0xee   :  { %1026 = vmatprep.subr.bf16.mxu0 %v2921_v30  ;;  %2769 = vmatpush3.bf16.msra.mxu1 %v3013_v29  ;;  %v3014_v30 = vld [vmem:[#allocation7 + $0x78] sm:$0xff]  }
  0xef   :  { %2770 = vmatprep.subr.bf16.mxu1 %v3014_v30  ;;  %v1485_v30 = vld [vmem:[#allocation10 + $0x158] sm:$0xff] }
  0xf1   :  { %1027 = vmatpush1.bf16.msra.mxu0 %v2919_v33  ;;  %v240_v33 = vlaneseq }
  0xf2   :  { %1028 = vmatprep.subr.bf16.mxu0 %v2924_v34  ;;  %2771 = vmatpush3.bf16.msra.mxu1 %v3015_v31  ;;  %v1489_v31 = vld [vmem:[#allocation10 + $0x178] sm:$0xff] }
  0xf3   :  { %1393 = vmatprep.subr.bf16.mxu1 %v3018_v32  ;;  %v3336_v34 = vshrl.u32 %v240_v33, 7  ;;  %v2674_v32 = vcombine.low %v1485_v30, %v1489_v31  ;;  %v2675_v33 = vcombine.high %v1485_v30, %v1489_v31  ;;  %v1478_v30 = vld [vmem:[#allocation10 + $0x120] sm:$0xff] }
  0xf5   :  { %1029 = vmatpush1.bf16.msra.mxu0 %v2922_v35  ;;  %v3339_v35 = vsub.s32 0, %v3336_v34 }
  0xf6   :  { %1030 = vmatprep.subr.bf16.mxu0 %v2927_v36  ;;  %v238_v36 = vld [vmem:[%s3406_s2] sm:$0x3] }
  0xf9   :  { %1031 = vmatpush1.bf16.msra.mxu0 %v2925_v37  ;;  %v3345_v37 = vsub.s32 1, %v3336_v34 }
  0xfa   :  { %1032 = vmatprep.subr.bf16.mxu0 %v2930_v38  ;;  %v243_v38 = vrot.slane %v238_v36, %v3339_v35 }
  0xfd   :  { %1033 = vmatpush1.bf16.msra.mxu0 %v2928_v39  ;;  %v247_v39 = vrot.slane %v238_v36, %v3345_v37  ;;  %v1493_v36 = vld [vmem:[#allocation10 + $0x198] sm:$0xff] }
  0xfe   :  { %1034 = vmatprep.subr.bf16.mxu0 %v2933_v40 }
 0x101   :  { %1035 = vmatpush1.bf16.msra.mxu0 %v2931_v41 }
 0x102   :  { %1036 = vmatprep.subr.bf16.mxu0 %v2936_v42 }
 0x105   :  { %1037 = vmatpush1.bf16.msra.mxu0 %v2934_v43 }
 0x106   :  { %1038 = vmatprep.subr.bf16.mxu0 %v2939_v44 }
 0x109   :  { %1039 = vmatpush1.bf16.msra.mxu0 %v2937_v45 }
 0x10a   :  { %1040 = vmatprep.subr.bf16.mxu0 %v2942_v46 }
 0x10d   :  { %1041 = vmatpush1.bf16.msra.mxu0 %v2940_v47 }
 0x10e   :  { %1042 = vmatprep.subr.bf16.mxu0 %v2945_v48 }
 0x111   :  { %1043 = vmatpush1.bf16.msra.mxu0 %v2943_v49 }
 0x112   :  { %1044 = vmatprep.subr.bf16.mxu0 %v2948_v50 }
 0x115   :  { %1045 = vmatpush1.bf16.msra.mxu0 %v2946_v51 }
 0x116   :  { %1046 = vmatprep.subr.bf16.mxu0 %v2951_v52 }
 0x119   :  { %1047 = vmatpush1.bf16.msra.mxu0 %v2949_v53 }
 0x11a   :  { %1059 = vmatprep.subr.bf16.mxu0 %v2954_v54  ;;  %v3016_v54 = vld [vmem:[#allocation8] ss:$8 sps:$4 sm:$0xff]  }
 0x11c   :  { %1049 = vmatmul.mubr.bf16.vlgmr.msra.gmra.mrb[0].mxu0 %v2463_v57  ;;  %v3024_v57 = vld [vmem:[#allocation8 + $0x24] ss:$8 sps:$4 sm:$0xff]  }
 0x11d   :  { %1060 = vmatpush1.bf16.msra.mxu0 %v2952_v58  ;;  %1091 = vmatprep.mubr.bf16.mxu0 %v2466_v59  ;;  %v3022_v58 = vld [vmem:[#allocation8 + $0x20] ss:$8 sps:$4 sm:$0xff]   ;;  %v3027_v59 = vld [vmem:[#allocation8 + $0x34] ss:$8 sps:$4 sm:$0xff]  }
 0x11e   :  { %1061 = vmatprep.subr.bf16.mxu0 %v2957_v60  ;;  %v3025_v60 = vld [vmem:[#allocation8 + $0x30] ss:$8 sps:$4 sm:$0xff]  }
 0x121   :  { %1062 = vmatpush1.bf16.msra.mxu0 %v2955_v61  ;;  %v3030_v61 = vld [vmem:[#allocation8 + $0x44] ss:$8 sps:$4 sm:$0xff]  }
 0x122   :  { %1063 = vmatprep.subr.bf16.mxu0 %v2960_v62  ;;  %v3028_v62 = vld [vmem:[#allocation8 + $0x40] ss:$8 sps:$4 sm:$0xff]  }
 0x125   :  { %1064 = vmatpush1.bf16.msra.mxu0 %v2958_v63  ;;  %v3033_v63 = vld [vmem:[#allocation8 + $0x54] ss:$8 sps:$4 sm:$0xff]  }
 0x126   :  { %1065 = vmatprep.subr.bf16.mxu0 %v2963_v0  ;;  %v3031_v0 = vld [vmem:[#allocation8 + $0x50] ss:$8 sps:$4 sm:$0xff]  }
 0x129   :  { %1066 = vmatpush1.bf16.msra.mxu0 %v2961_v1  ;;  %v3036_v1 = vld [vmem:[#allocation8 + $0x64] ss:$8 sps:$4 sm:$0xff]  }
 0x12a   :  { %1067 = vmatprep.subr.bf16.mxu0 %v2966_v2  ;;  %v3034_v2 = vld [vmem:[#allocation8 + $0x60] ss:$8 sps:$4 sm:$0xff]  }
 0x12d   :  { %1068 = vmatpush1.bf16.msra.mxu0 %v2964_v3  ;;  %v3039_v3 = vld [vmem:[#allocation8 + $0x74] ss:$8 sps:$4 sm:$0xff]  }
 0x12e   :  { %1069 = vmatprep.subr.bf16.mxu0 %v2969_v4  ;;  %v3037_v4 = vld [vmem:[#allocation8 + $0x70] ss:$8 sps:$4 sm:$0xff]  }
 0x131   :  { %1070 = vmatpush1.bf16.msra.mxu0 %v2967_v5  ;;  %v3191_v5 = vmov 0  }
 0x132   :  { %1071 = vmatprep.subr.bf16.mxu0 %v2972_v6  ;;  %v3349_v6 = vld [vmem:[#allocation10] sm:$0xff] }
 0x135   :  { %1072 = vmatpush1.bf16.msra.mxu0 %v2970_v7  ;;  %v3351_v7 = vld [vmem:[#allocation10 + $0x20] sm:$0xff] }
 0x136   :  { %1073 = vmatprep.subr.bf16.mxu0 %v2975_v8  ;;  %v2628_v8 = vcombine.low %v3349_v6, %v3351_v7 }
 0x139   :  { %1074 = vmatpush1.bf16.msra.mxu0 %v2973_v9  ;;  %v2629_v9 = vcombine.high %v3349_v6, %v3351_v7 }
 0x13a   :  { %1075 = vmatprep.subr.bf16.mxu0 %v2978_v10  ;;  %v1445_v10 = vld [vmem:[#allocation10 + $0x18] sm:$0xff] }
 0x13d   :  { %1076 = vmatpush1.bf16.msra.mxu0 %v2976_v11  ;;  %v1449_v11 = vld [vmem:[#allocation10 + $0x38] sm:$0xff] }
 0x13e   :  { %1077 = vmatprep.subr.bf16.mxu0 %v2981_v12  ;;  %v2634_v12 = vcombine.low %v1445_v10, %v1449_v11 }
 0x141   :  { %1078 = vmatpush1.bf16.msra.mxu0 %v2979_v13  ;;  %v2635_v13 = vcombine.high %v1445_v10, %v1449_v11 }
 0x142   :  { %1079 = vmatprep.subr.bf16.mxu0 %v2984_v14  ;;  %v1453_v14 = vld [vmem:[#allocation10 + $0x58] sm:$0xff] }
 0x145   :  { %1080 = vmatpush1.bf16.msra.mxu0 %v2982_v15  ;;  %v1457_v15 = vld [vmem:[#allocation10 + $0x78] sm:$0xff] }
 0x146   :  { %1081 = vmatprep.subr.bf16.mxu0 %v2987_v16  ;;  %v2642_v16 = vcombine.low %v1453_v14, %v1457_v15 }
 0x149   :  { %1082 = vmatpush1.bf16.msra.mxu0 %v2985_v17  ;;  %v2643_v17 = vcombine.high %v1453_v14, %v1457_v15  ;;  %v1450_v15 = vld [vmem:[#allocation10 + $0x40] sm:$0xff] }
 0x14a   :  { %1083 = vmatprep.subr.bf16.mxu0 %v2990_v18  ;;  %v1461_v18 = vld [vmem:[#allocation10 + $0x98] sm:$0xff] }
 0x14d   :  { %1084 = vmatpush1.bf16.msra.mxu0 %v2988_v19  ;;  %v1465_v19 = vld [vmem:[#allocation10 + $0xb8] sm:$0xff] }
 0x14e   :  { %1085 = vmatprep.subr.bf16.mxu0 %v2993_v20  ;;  %v2650_v20 = vcombine.low %v1461_v18, %v1465_v19 }
 0x151   :  { %1086 = vmatpush1.bf16.msra.mxu0 %v2991_v21  ;;  %v2651_v21 = vcombine.high %v1461_v18, %v1465_v19 }
 0x152   :  { %1087 = vmatprep.subr.bf16.mxu0 %v2996_v22  ;;  %v1469_v22 = vld [vmem:[#allocation10 + $0xd8] sm:$0xff] }
 0x155   :  { %1088 = vmatpush1.bf16.msra.mxu0 %v2994_v23  ;;  %v1473_v23 = vld [vmem:[#allocation10 + $0xf8] sm:$0xff] }
 0x156   :  { %1089 = vmatprep.subr.bf16.mxu0 %v2999_v24  ;;  %v2658_v24 = vcombine.low %v1469_v22, %v1473_v23 }
 0x159   :  { %1090 = vmatpush1.bf16.msra.mxu0 %v2997_v25  ;;  %v2659_v25 = vcombine.high %v1469_v22, %v1473_v23  ;;  %v1462_v22 = vld [vmem:[#allocation10 + $0xa0] sm:$0xff] }
 0x15a   :  { %2381 = vmatprep.subr.bf16.mxu0 %v2635_v13 }
 0x15c   :  { %1092 = vmatmul.mubr.bf16.vlgmr.msra.gmra.mrb[0].mxu0 %v2465_v26  ;;  %v1477_v26 = vld [vmem:[#allocation10 + $0x118] sm:$0xff] }
 0x15d   :  { %2382 = vmatpush1.bf16.msra.mxu0 %v2634_v12  ;;  %v2666_v28 = vcombine.low %v1477_v26, %v1481_v27  ;;  %v2667_v29 = vcombine.high %v1477_v26, %v1481_v27  ;;  %v2595_v12 = vld [vmem:[%s3408_s4] ss:$0 sm:$0xff] }
 0x15e   :  { %2383 = vmatprep.subr.bf16.mxu0 %v2643_v17  ;;  %v1470_v26 = vld [vmem:[#allocation10 + $0xe0] sm:$0xff] }
 0x161   :  { %2384 = vmatpush1.bf16.msra.mxu0 %v2642_v16  ;;  %v1454_v16 = vld [vmem:[#allocation10 + $0x60] sm:$0xff] }
 0x162   :  { %2385 = vmatprep.subr.bf16.mxu0 %v2651_v21  ;;  %v1458_v21 = vld [vmem:[#allocation10 + $0x80] sm:$0xff]  ;;  %v2636_v23 = vcombine.low %v1450_v15, %v1454_v16 }
 0x163   :  { %v2644_v27 = vcombine.low %v1458_v21, %v1462_v22 }
 0x165   :  { %2386 = vmatpush1.bf16.msra.mxu0 %v2650_v20  ;;  %v2637_v20 = vcombine.high %v1450_v15, %v1454_v16 }
 0x166   :  { %2387 = vmatprep.subr.bf16.mxu0 %v2659_v25  ;;  %v1466_v25 = vld [vmem:[#allocation10 + $0xc0] sm:$0xff] }
 0x167   :  { %v2652_v31 = vcombine.low %v1466_v25, %v1470_v26 }
 0x169   :  { %2388 = vmatpush1.bf16.msra.mxu0 %v2658_v24  ;;  %v2645_v24 = vcombine.high %v1458_v21, %v1462_v22  ;;  %v1569_v21 = vld [vmem:[#allocation10 + $0x3f8] sm:$0xff] }
 0x16a   :  { %2389 = vmatprep.subr.bf16.mxu0 %v2667_v29  ;;  %v1474_v29 = vld [vmem:[#allocation10 + $0x100] sm:$0xff] }
 0x16b   :  { %v2660_v6 = vcombine.low %v1474_v29, %v1478_v30 }
 0x16d   :  { %2390 = vmatpush1.bf16.msra.mxu0 %v2666_v28  ;;  %v2653_v28 = vcombine.high %v1466_v25, %v1470_v26  ;;  %v1443_v25 = vld [vmem:[#allocation10 + $0x8] sm:$0xff] }
 0x16e   :  { %2391 = vmatprep.subr.bf16.mxu0 %v2675_v33  ;;  %v1482_v33 = vld [vmem:[#allocation10 + $0x140] sm:$0xff]  ;;  %v1447_v26 = vld [vmem:[#allocation10 + $0x28] sm:$0xff] }
 0x171   :  { %2392 = vmatpush1.bf16.msra.mxu0 %v2674_v32  ;;  %v2661_v32 = vcombine.high %v1474_v29, %v1478_v30  ;;  %v1301_v29 = vld [vmem:[%s3410_s6] sm:$0x3] }
 0x172   :  { %v1306_v30 = vrot.slane %v1301_v29, %v3339_v35 }
 0x22f   :  { %v1093_v40 = vpop.f32.mrb[0].mxu0 }
 0x230   :  { %v2778_v41 = vadd.f32 %v1093_v40, %v243_v38  ;;  %v1095_v42 = vpop.f32.mrb[1].mxu0 }
 0x231   :  { %v2779_v43 = vadd.f32 %v1095_v42, %v247_v39  ;;  %v1097_v44 = vpop.f32.mrb[2].mxu0  ;;  %v1505_v42 = vld [vmem:[#allocation10 + $0x1f8] sm:$0xff] }
 0x232   :  { %v2780_v45 = vadd.f32 %v1097_v44, %v243_v38  ;;  %v1099_v46 = vpop.f32.mrb[3].mxu0  ;;  %v1102_v48 = vmax.f32 %v2778_v41, 0.0  ;;  %v1497_v38 = vld [vmem:[#allocation10 + $0x1b8] sm:$0xff] }
 0x233   :  { %v2781_v47 = vadd.f32 %v1099_v46, %v247_v39  ;;  %v1103_v50 = vmax.f32 %v2779_v43, 0.0  ;;  %v2682_v39 = vcombine.low %v1493_v36, %v1497_v38  ;;  %v2683_v40 = vcombine.high %v1493_v36, %v1497_v38  ;;  %v1501_v41 = vld [vmem:[#allocation10 + $0x1d8] sm:$0xff]  ;;  %v1486_v36 = vld [vmem:[#allocation10 + $0x160] sm:$0xff] }
 0x234   :  { %v1104_v49 = vmax.f32 %v2780_v45, 0.0  ;;  %v2690_v43 = vcombine.low %v1501_v41, %v1505_v42  ;;  %v2691_v44 = vcombine.high %v1501_v41, %v1505_v42  ;;  %v1509_v45 = vld [vmem:[#allocation10 + $0x218] sm:$0xff]  ;;  %v2669_v7 = vcombine.high %v1482_v33, %v1486_v36  ;;  %v1494_v38 = vld [vmem:[#allocation10 + $0x1a0] sm:$0xff] }
 0x235   :  { %v1105_v51 = vmax.f32 %v2781_v47, 0.0  ;;  %2393 = vmatprep.subr.bf16.mxu0 %v2683_v40  ;;  %v1513_v46 = vld [vmem:[#allocation10 + $0x238] sm:$0xff]  ;;  %v1498_v41 = vld [vmem:[#allocation10 + $0x1c0] sm:$0xff] }
 0x236   :  { %v1106_v52 = vpack.c.bf16 %v1104_v49, %v1102_v48  ;;  %2394 = vmatpush1.bf16.msra.mxu0 %v2682_v39  ;;  %v2698_v47 = vcombine.low %v1509_v45, %v1513_v46  ;;  %v2699_v48 = vcombine.high %v1509_v45, %v1513_v46  ;;  %v1517_v49 = vld [vmem:[#allocation10 + $0x258] sm:$0xff]  ;;  %v2668_v39 = vcombine.low %v1482_v33, %v1486_v36  ;;  %v1502_v42 = vld [vmem:[#allocation10 + $0x1e0] sm:$0xff] }
 0x237   :  { %v1107_v53 = vpack.c.bf16 %v1105_v51, %v1103_v50  ;;  %2395 = vmatprep.subr.bf16.mxu0 %v2691_v44  ;;  %v1521_v50 = vld [vmem:[#allocation10 + $0x278] sm:$0xff]  ;;  %v2685_v44 = vcombine.high %v1498_v41, %v1502_v42  ;;  %v1506_v45 = vld [vmem:[#allocation10 + $0x200] sm:$0xff] }
 0x238   :  { %v2706_v51 = vcombine.low %v1517_v49, %v1521_v50  ;;  %v1510_v46 = vld [vmem:[#allocation10 + $0x220] sm:$0xff] }
 0x239   :  { %1275 = vmatprep.mubr.bf16.mxu1 %v1107_v53  ;;  %v1525_v53 = vld [vmem:[#allocation10 + $0x298] sm:$0xff] }
 0x23a   :  { %1276 = vmatmul.mubr.bf16.vlgmr.msra.gmra.mrb[0].mxu1 %v1106_v52  ;;  %2396 = vmatpush1.bf16.msra.mxu0 %v2690_v43  ;;  %v2707_v52 = vcombine.high %v1517_v49, %v1521_v50  ;;  %v1514_v49 = vld [vmem:[#allocation10 + $0x240] sm:$0xff] }
 0x23b   :  { %1394 = vmatpush1.bf16.msra.mxu1 %v3016_v54  ;;  %1425 = vmatprep.mubr.bf16.mxu1 %v3191_v5  ;;  %v1529_v54 = vld [vmem:[#allocation10 + $0x2b8] sm:$0xff]  ;;  %v1518_v50 = vld [vmem:[#allocation10 + $0x260] sm:$0xff] }
 0x23c   :  { %1395 = vmatprep.subr.bf16.mxu1 %v3021_v55  ;;  %2397 = vmatprep.subr.bf16.mxu0 %v2699_v48  ;;  %v2714_v55 = vcombine.low %v1525_v53, %v1529_v54  ;;  %v2693_v48 = vcombine.high %v1506_v45, %v1510_v46 }
 0x23e   :  { %2398 = vmatpush1.bf16.msra.mxu0 %v2698_v47  ;;  %v2684_v47 = vcombine.low %v1498_v41, %v1502_v42 }
 0x23f   :  { %1396 = vmatpush1.bf16.msra.mxu1 %v3019_v56  ;;  %2399 = vmatprep.subr.bf16.mxu0 %v2707_v52  ;;  %v2715_v56 = vcombine.high %v1525_v53, %v1529_v54  ;;  %v2701_v52 = vcombine.high %v1514_v49, %v1518_v50  ;;  %v1522_v53 = vld [vmem:[#allocation10 + $0x280] sm:$0xff] }
 0x240   :  { %1397 = vmatprep.subr.bf16.mxu1 %v3024_v57  ;;  %v1533_v57 = vld [vmem:[#allocation10 + $0x2d8] sm:$0xff]  ;;  %v1526_v54 = vld [vmem:[#allocation10 + $0x2a0] sm:$0xff] }
 0x242   :  { %2400 = vmatpush1.bf16.msra.mxu0 %v2706_v51  ;;  %v2692_v51 = vcombine.low %v1506_v45, %v1510_v46  ;;  %v1455_v45 = vld [vmem:[#allocation10 + $0x68] sm:$0xff] }
 0x243   :  { %1398 = vmatpush1.bf16.msra.mxu1 %v3022_v58  ;;  %2401 = vmatprep.subr.bf16.mxu0 %v2715_v56  ;;  %v1537_v58 = vld [vmem:[#allocation10 + $0x2f8] sm:$0xff]  ;;  %v2709_v56 = vcombine.high %v1522_v53, %v1526_v54 }
 0x244   :  { %1399 = vmatprep.subr.bf16.mxu1 %v3027_v59  ;;  %v2722_v59 = vcombine.low %v1533_v57, %v1537_v58 }
 0x246   :  { %2402 = vmatpush1.bf16.msra.mxu0 %v2714_v55  ;;  %v2700_v55 = vcombine.low %v1514_v49, %v1518_v50  ;;  %v1459_v49 = vld [vmem:[#allocation10 + $0x88] sm:$0xff] }
 0x247   :  { %1400 = vmatpush1.bf16.msra.mxu1 %v3025_v60  ;;  %v2723_v60 = vcombine.high %v1533_v57, %v1537_v58  ;;  %v1530_v57 = vld [vmem:[#allocation10 + $0x2c0] sm:$0xff]  ;;  %v1463_v50 = vld [vmem:[#allocation10 + $0xa8] sm:$0xff] }
 0x248   :  { %1401 = vmatprep.subr.bf16.mxu1 %v3030_v61  ;;  %v1541_v61 = vld [vmem:[#allocation10 + $0x318] sm:$0xff]  ;;  %v1534_v58 = vld [vmem:[#allocation10 + $0x2e0] sm:$0xff] }
 0x249   :  { %2403 = vmatprep.subr.bf16.mxu0 %v2723_v60  ;;  %v2717_v60 = vcombine.high %v1530_v57, %v1534_v58 }
 0x24a   :  { %2404 = vmatpush1.bf16.msra.mxu0 %v2722_v59  ;;  %v2708_v59 = vcombine.low %v1522_v53, %v1526_v54  ;;  %v1467_v53 = vld [vmem:[#allocation10 + $0xc8] sm:$0xff] }
 0x24b   :  { %1402 = vmatpush1.bf16.msra.mxu1 %v3028_v62  ;;  %v1545_v62 = vld [vmem:[#allocation10 + $0x338] sm:$0xff]  ;;  %v1471_v54 = vld [vmem:[#allocation10 + $0xe8] sm:$0xff] }
 0x24c   :  { %1403 = vmatprep.subr.bf16.mxu1 %v3033_v63  ;;  %v2730_v63 = vcombine.low %v1541_v61, %v1545_v62 }
 0x24f   :  { %1404 = vmatpush1.bf16.msra.mxu1 %v3031_v0  ;;  %v2731_v0 = vcombine.high %v1541_v61, %v1545_v62  ;;  %v1538_v61 = vld [vmem:[#allocation10 + $0x300] sm:$0xff] }
 0x250   :  { %1405 = vmatprep.subr.bf16.mxu1 %v3036_v1  ;;  %v1549_v1 = vld [vmem:[#allocation10 + $0x358] sm:$0xff]  ;;  %v1542_v62 = vld [vmem:[#allocation10 + $0x320] sm:$0xff] }
 0x251   :  { %2405 = vmatprep.subr.bf16.mxu0 %v2731_v0  ;;  %v2725_v0 = vcombine.high %v1538_v61, %v1542_v62 }
 0x252   :  { %2406 = vmatpush1.bf16.msra.mxu0 %v2730_v63  ;;  %v2716_v63 = vcombine.low %v1530_v57, %v1534_v58  ;;  %v1475_v57 = vld [vmem:[#allocation10 + $0x108] sm:$0xff] }
 0x253   :  { %1406 = vmatpush1.bf16.msra.mxu1 %v3034_v2  ;;  %v1553_v2 = vld [vmem:[#allocation10 + $0x378] sm:$0xff]  ;;  %v1479_v58 = vld [vmem:[#allocation10 + $0x128] sm:$0xff] }
 0x254   :  { %1407 = vmatprep.subr.bf16.mxu1 %v3039_v3  ;;  %v2738_v3 = vcombine.low %v1549_v1, %v1553_v2 }
 0x257   :  { %1408 = vmatpush1.bf16.msra.mxu1 %v3037_v4  ;;  %v2739_v4 = vcombine.high %v1549_v1, %v1553_v2  ;;  %v1546_v1 = vld [vmem:[#allocation10 + $0x340] sm:$0xff] }
 0x258   :  { %2252 = vmatprep.subr.bf16.mxu1 %v2629_v9  ;;  %v1550_v2 = vld [vmem:[#allocation10 + $0x360] sm:$0xff] }
 0x259   :  { %2407 = vmatprep.subr.bf16.mxu0 %v2739_v4  ;;  %v2733_v4 = vcombine.high %v1546_v1, %v1550_v2 }
 0x25a   :  { %2408 = vmatpush1.bf16.msra.mxu0 %v2738_v3  ;;  %v2724_v3 = vcombine.low %v1538_v61, %v1542_v62  ;;  %v1483_v61 = vld [vmem:[#allocation10 + $0x148] sm:$0xff] }
 0x25b   :  { %v1487_v62 = vld [vmem:[#allocation10 + $0x168] sm:$0xff] }
 0x30d   :  { %v2772_v5 = vpop.f32.mrb[0].mxu1 }
 0x30e   :  { %v2773_v9 = vpop.f32.mrb[1].mxu1 }
 0x30f   :  { %v2774_v10 = vadd.f32 %v2773_v9, %v2772_v5  ;;  %v2775_v11 = vpop.f32.mrb[2].mxu1  ;;  %v2732_v5 = vcombine.low %v1546_v1, %v1550_v2  ;;  %v1554_v9 = vld [vmem:[#allocation10 + $0x380] sm:$0xff]  ;;  %v1491_v1 = vld [vmem:[#allocation10 + $0x188] sm:$0xff] }
 0x310   :  { %v2776_v13 = vpop.f32.mrb[3].mxu1  ;;  %v1495_v2 = vld [vmem:[#allocation10 + $0x1a8] sm:$0xff] }
 0x311   :  { %v2777_v14 = vadd.f32 %v2776_v13, %v2775_v11  ;;  %v1278_v17 = vadd.f32 %v2774_v10, %v2595_v12  ;;  %v1558_v10 = vld [vmem:[#allocation10 + $0x3a0] sm:$0xff]  ;;  %v1561_v13 = vld [vmem:[#allocation10 + $0x3b8] sm:$0xff] }
 0x312   :  { %v2741_v11 = vcombine.high %v1554_v9, %v1558_v10 }
 0x313   :  { %v1281_v18 = vadd.f32 %v2777_v14, %v2595_v12  ;;  %v1557_v12 = vld [vmem:[#allocation10 + $0x398] sm:$0xff]  ;;  %v2740_v14 = vcombine.low %v1554_v9, %v1558_v10  ;;  %v1503_v9 = vld [vmem:[#allocation10 + $0x1e8] sm:$0xff]  ;;  %v2678_v10 = vcombine.low %v1491_v1, %v1495_v2 }
 0x314   :  { %v2747_v15 = vcombine.high %v1557_v12, %v1561_v13  ;;  %v2746_v16 = vcombine.low %v1557_v12, %v1561_v13  ;;  %v1507_v12 = vld [vmem:[#allocation10 + $0x208] sm:$0xff] }
 0x315   :  { %v1284_v19 = vpack.c.bf16 %v1281_v18, %v1278_v17  ;;  %v1562_v17 = vld [vmem:[#allocation10 + $0x3c0] sm:$0xff]  ;;  %v1511_v13 = vld [vmem:[#allocation10 + $0x228] sm:$0xff] }
 0x316   :  { %2409 = vmatprep.subr.bf16.mxu0 %v2747_v15  ;;  %v1566_v18 = vld [vmem:[#allocation10 + $0x3e0] sm:$0xff]  ;;  %v2695_v15 = vcombine.high %v1507_v12, %v1511_v13 }
 0x317   :  { %1426 = vmatmul.mubr.bf16.vlgmr.msra.gmra.mrb[4].mxu1 %v1284_v19  ;;  %2410 = vmatpush1.bf16.msra.mxu0 %v2746_v16  ;;  %v2749_v19 = vcombine.high %v1562_v17, %v1566_v18  ;;  %v2748_v22 = vcombine.low %v1562_v17, %v1566_v18  ;;  %v1515_v16 = vld [vmem:[#allocation10 + $0x248] sm:$0xff]  ;;  %v2694_v18 = vcombine.low %v1507_v12, %v1511_v13  ;;  %v1500_v12 = vld [vmem:[#allocation10 + $0x1d0] sm:$0xff] }
 0x318   :  { %2253 = vmatpush1.bf16.msra.mxu1 %v2628_v8  ;;  %v1490_v8 = vld [vmem:[#allocation10 + $0x180] sm:$0xff]  ;;  %v1519_v17 = vld [vmem:[#allocation10 + $0x268] sm:$0xff]  ;;  %v1504_v13 = vld [vmem:[#allocation10 + $0x1f0] sm:$0xff] }
 0x319   :  { %2254 = vmatprep.subr.bf16.mxu1 %v2637_v20  ;;  %v2677_v40 = vcombine.high %v1490_v8, %v1494_v38  ;;  %v2676_v43 = vcombine.low %v1490_v8, %v1494_v38  ;;  %v1565_v20 = vld [vmem:[#allocation10 + $0x3d8] sm:$0xff] }
 0x31c   :  { %2255 = vmatpush1.bf16.msra.mxu1 %v2636_v23  ;;  %v2755_v23 = vcombine.high %v1565_v20, %v1569_v21 }
 0x31d   :  { %2256 = vmatprep.subr.bf16.mxu1 %v2645_v24  ;;  %v2754_v24 = vcombine.low %v1565_v20, %v1569_v21  ;;  %v1523_v20 = vld [vmem:[#allocation10 + $0x288] sm:$0xff] }
 0x31e   :  { %2411 = vmatprep.subr.bf16.mxu0 %v2755_v23  ;;  %v1527_v21 = vld [vmem:[#allocation10 + $0x2a8] sm:$0xff] }
 0x31f   :  { %2412 = vmatpush1.bf16.msra.mxu0 %v2754_v24  ;;  %v2711_v23 = vcombine.high %v1523_v20, %v1527_v21  ;;  %v1531_v24 = vld [vmem:[#allocation10 + $0x2c8] sm:$0xff] }
 0x320   :  { %2257 = vmatpush1.bf16.msra.mxu1 %v2644_v27  ;;  %v2631_v27 = vcombine.high %v1443_v25, %v1447_v26 }
 0x321   :  { %2258 = vmatprep.subr.bf16.mxu1 %v2653_v28  ;;  %v2630_v28 = vcombine.low %v1443_v25, %v1447_v26  ;;  %v1535_v25 = vld [vmem:[#allocation10 + $0x2e8] sm:$0xff]  ;;  %v2710_v26 = vcombine.low %v1523_v20, %v1527_v21  ;;  %v1516_v20 = vld [vmem:[#allocation10 + $0x250] sm:$0xff] }
 0x322   :  { %v1520_v21 = vld [vmem:[#allocation10 + $0x270] sm:$0xff] }
 0x324   :  { %2259 = vmatpush1.bf16.msra.mxu1 %v2652_v31  ;;  %v1310_v31 = vrot.slane %v1301_v29, %v3345_v37  ;;  %v1543_v29 = vld [vmem:[#allocation10 + $0x328] sm:$0xff] }
 0x325   :  { %2260 = vmatprep.subr.bf16.mxu1 %v2661_v32 }
 0x328   :  { %2261 = vmatpush1.bf16.msra.mxu1 %v2660_v6 }
 0x329   :  { %2262 = vmatprep.subr.bf16.mxu1 %v2669_v7 }
 0x32c   :  { %2263 = vmatpush1.bf16.msra.mxu1 %v2668_v39 }
 0x32d   :  { %2264 = vmatprep.subr.bf16.mxu1 %v2677_v40 }
 0x330   :  { %2265 = vmatpush1.bf16.msra.mxu1 %v2676_v43 }
 0x331   :  { %2266 = vmatprep.subr.bf16.mxu1 %v2685_v44  ;;  %v1451_v44 = vld [vmem:[#allocation10 + $0x48] sm:$0xff] }
 0x334   :  { %2267 = vmatpush1.bf16.msra.mxu1 %v2684_v47 }
 0x335   :  { %2268 = vmatprep.subr.bf16.mxu1 %v2693_v48  ;;  %v2639_v48 = vcombine.high %v1451_v44, %v1455_v45 }
 0x338   :  { %2269 = vmatpush1.bf16.msra.mxu1 %v2692_v51  ;;  %v2638_v51 = vcombine.low %v1451_v44, %v1455_v45  ;;  %v1444_v44 = vld [vmem:[#allocation10 + $0x10] sm:$0xff] }
 0x339   :  { %2270 = vmatprep.subr.bf16.mxu1 %v2701_v52  ;;  %v2647_v52 = vcombine.high %v1459_v49, %v1463_v50  ;;  %v1448_v45 = vld [vmem:[#allocation10 + $0x30] sm:$0xff] }
 0x33c   :  { %2271 = vmatpush1.bf16.msra.mxu1 %v2700_v55  ;;  %v2646_v55 = vcombine.low %v1459_v49, %v1463_v50  ;;  %v2633_v49 = vcombine.high %v1444_v44, %v1448_v45  ;;  %v1452_v50 = vld [vmem:[#allocation10 + $0x50] sm:$0xff] }
 0x33d   :  { %2272 = vmatprep.subr.bf16.mxu1 %v2709_v56  ;;  %v2655_v56 = vcombine.high %v1467_v53, %v1471_v54 }
 0x340   :  { %2273 = vmatpush1.bf16.msra.mxu1 %v2708_v59  ;;  %v2654_v59 = vcombine.low %v1467_v53, %v1471_v54  ;;  %v1460_v54 = vld [vmem:[#allocation10 + $0x90] sm:$0xff] }
 0x341   :  { %2274 = vmatprep.subr.bf16.mxu1 %v2717_v60  ;;  %v2663_v60 = vcombine.high %v1475_v57, %v1479_v58 }
 0x344   :  { %2275 = vmatpush1.bf16.msra.mxu1 %v2716_v63  ;;  %v2662_v63 = vcombine.low %v1475_v57, %v1479_v58  ;;  %v1468_v58 = vld [vmem:[#allocation10 + $0xd0] sm:$0xff] }
 0x345   :  { %2276 = vmatprep.subr.bf16.mxu1 %v2725_v0  ;;  %v2671_v0 = vcombine.high %v1483_v61, %v1487_v62 }
 0x348   :  { %2277 = vmatpush1.bf16.msra.mxu1 %v2724_v3  ;;  %v2670_v3 = vcombine.low %v1483_v61, %v1487_v62  ;;  %v1476_v62 = vld [vmem:[#allocation10 + $0x110] sm:$0xff] }
 0x349   :  { %2278 = vmatprep.subr.bf16.mxu1 %v2733_v4  ;;  %v2679_v4 = vcombine.high %v1491_v1, %v1495_v2  ;;  %v1484_v2 = vld [vmem:[#allocation10 + $0x150] sm:$0xff] }
 0x34c   :  { %2279 = vmatpush1.bf16.msra.mxu1 %v2732_v5  ;;  %v1499_v5 = vld [vmem:[#allocation10 + $0x1c8] sm:$0xff] }
 0x34d   :  { %2280 = vmatprep.subr.bf16.mxu1 %v2741_v11  ;;  %v2687_v11 = vcombine.high %v1499_v5, %v1503_v9 }
 0x350   :  { %2281 = vmatpush1.bf16.msra.mxu1 %v2740_v14  ;;  %v2686_v14 = vcombine.low %v1499_v5, %v1503_v9  ;;  %v1492_v5 = vld [vmem:[#allocation10 + $0x190] sm:$0xff] }
 0x351   :  { %2282 = vmatprep.subr.bf16.mxu1 %v2749_v19  ;;  %v2703_v19 = vcombine.high %v1515_v16, %v1519_v17  ;;  %v1496_v9 = vld [vmem:[#allocation10 + $0x1b0] sm:$0xff] }
 0x354   :  { %2283 = vmatpush1.bf16.msra.mxu1 %v2748_v22  ;;  %v2702_v22 = vcombine.low %v1515_v16, %v1519_v17  ;;  %v1508_v16 = vld [vmem:[#allocation10 + $0x210] sm:$0xff] }
 0x355   :  { %2295 = vmatprep.subr.bf16.mxu1 %v2631_v27  ;;  %v2719_v27 = vcombine.high %v1531_v24, %v1535_v25  ;;  %v1512_v17 = vld [vmem:[#allocation10 + $0x230] sm:$0xff] }
 0x3ea   :  { %v1427_v32 = vpop.f32.mrb[4].mxu1 }
 0x3eb   :  { %v1428_v33 = vadd.f32 %v1427_v32, %v1306_v30  ;;  %v1429_v36 = vpop.f32.mrb[5].mxu1  ;;  %v1547_v32 = vld [vmem:[#allocation10 + $0x348] sm:$0xff] }
 0x3ec   :  { %v1430_v6 = vadd.f32 %v1429_v36, %v1310_v31  ;;  %v1431_v7 = vpop.f32.mrb[6].mxu1 }
 0x3ed   :  { %v1432_v8 = vadd.f32 %v1431_v7, %v1306_v30  ;;  %v1433_v38 = vpop.f32.mrb[7].mxu1  ;;  %v1436_v40 = vmax.f32 %v1428_v33, 0.0  ;;  %v2718_v30 = vcombine.low %v1531_v24, %v1535_v25  ;;  %v1551_v33 = vld [vmem:[#allocation10 + $0x368] sm:$0xff]  ;;  %v1524_v24 = vld [vmem:[#allocation10 + $0x290] sm:$0xff] }
 0x3ee   :  { %v1434_v39 = vadd.f32 %v1433_v38, %v1310_v31  ;;  %v1437_v42 = vmax.f32 %v1430_v6, 0.0  ;;  %v2735_v6 = vcombine.high %v1547_v32, %v1551_v33  ;;  %v1555_v7 = vld [vmem:[#allocation10 + $0x388] sm:$0xff]  ;;  %v2734_v38 = vcombine.low %v1547_v32, %v1551_v33  ;;  %v1528_v25 = vld [vmem:[#allocation10 + $0x2b0] sm:$0xff] }
 0x3ef   :  { %v1438_v41 = vmax.f32 %v1432_v8, 0.0  ;;  %v1559_v8 = vld [vmem:[#allocation10 + $0x3a8] sm:$0xff]  ;;  %v1540_v32 = vld [vmem:[#allocation10 + $0x310] sm:$0xff] }
 0x3f0   :  { %v1439_v43 = vmax.f32 %v1434_v39, 0.0  ;;  %v2743_v39 = vcombine.high %v1555_v7, %v1559_v8  ;;  %v1544_v33 = vld [vmem:[#allocation10 + $0x330] sm:$0xff] }
 0x3f1   :  { %v3368_v46 = vpack.c.bf16 %v1438_v41, %v1436_v40  ;;  %v1563_v40 = vld [vmem:[#allocation10 + $0x3c8] sm:$0xff] }
 0x3f2   :  { %v3370_v47 = vpack.c.bf16 %v1439_v43, %v1437_v42  ;;  %v1567_v41 = vld [vmem:[#allocation10 + $0x3e8] sm:$0xff]  ;;  %v2742_v42 = vcombine.low %v1555_v7, %v1559_v8  ;;  %v1548_v7 = vld [vmem:[#allocation10 + $0x350] sm:$0xff] }
 0x3f3   :  { %v2751_v43 = vcombine.high %v1563_v40, %v1567_v41  ;;  %v1552_v8 = vld [vmem:[#allocation10 + $0x370] sm:$0xff] }
 0x3f4   :  { %2284 = vmatprep.mubr.bf16.mxu1 %v3370_v47  ;;  %2413 = vmatprep.mubr.bf16.mxu0 %v3370_v47 }
 0x3f5   :  { %2285 = vmatmul.mubr.bf16.vlgmr.msra.gmra.mrb[8].mxu1 %v3368_v46  ;;  %2414 = vmatmul.mubr.bf16.vlgmr.msra.gmra.mrb[4].mxu0 %v3368_v46 }
 0x3f6   :  { %2296 = vmatpush1.bf16.msra.mxu1 %v2630_v28  ;;  %2327 = vmatprep.mubr.bf16.mxu1 %v3370_v47  ;;  %v1539_v28 = vld [vmem:[#allocation10 + $0x308] sm:$0xff] }
 0x3f7   :  { %2297 = vmatprep.subr.bf16.mxu1 %v2639_v48  ;;  %v2727_v31 = vcombine.high %v1539_v28, %v1543_v29  ;;  %v2726_v36 = vcombine.low %v1539_v28, %v1543_v29  ;;  %v2750_v48 = vcombine.low %v1563_v40, %v1567_v41  ;;  %v1532_v28 = vld [vmem:[#allocation10 + $0x2d0] sm:$0xff] }
 0x3f8   :  { %v1536_v29 = vld [vmem:[#allocation10 + $0x2f0] sm:$0xff] }
 0x3f9   :  { %v1556_v40 = vld [vmem:[#allocation10 + $0x390] sm:$0xff] }
 0x3fa   :  { %2298 = vmatpush1.bf16.msra.mxu1 %v2638_v51  ;;  %v1456_v51 = vld [vmem:[#allocation10 + $0x70] sm:$0xff] }
 0x3fb   :  { %2299 = vmatprep.subr.bf16.mxu1 %v2647_v52  ;;  %v2632_v52 = vcombine.low %v1444_v44, %v1448_v45  ;;  %v2641_v53 = vcombine.high %v1452_v50, %v1456_v51  ;;  %v1560_v41 = vld [vmem:[#allocation10 + $0x3b0] sm:$0xff] }
 0x3fc   :  { %v1564_v44 = vld [vmem:[#allocation10 + $0x3d0] sm:$0xff] }
 0x3fd   :  { %v1568_v45 = vld [vmem:[#allocation10 + $0x3f0] sm:$0xff] }
 0x3fe   :  { %2300 = vmatpush1.bf16.msra.mxu1 %v2646_v55  ;;  %v1464_v55 = vld [vmem:[#allocation10 + $0xb0] sm:$0xff] }
 0x3ff   :  { %2301 = vmatprep.subr.bf16.mxu1 %v2655_v56  ;;  %v2640_v56 = vcombine.low %v1452_v50, %v1456_v51  ;;  %v2649_v57 = vcombine.high %v1460_v54, %v1464_v55  ;;  %v2752_v50 = vcombine.low %v1564_v44, %v1568_v45  ;;  %v1598_v51 = vsub.s32 6, %v3336_v34 }
 0x402   :  { %2302 = vmatpush1.bf16.msra.mxu1 %v2654_v59  ;;  %v1472_v59 = vld [vmem:[#allocation10 + $0xf0] sm:$0xff] }
 0x403   :  { %2303 = vmatprep.subr.bf16.mxu1 %v2663_v60  ;;  %v2648_v60 = vcombine.low %v1460_v54, %v1464_v55  ;;  %v2657_v61 = vcombine.high %v1468_v58, %v1472_v59 }
 0x406   :  { %2304 = vmatpush1.bf16.msra.mxu1 %v2662_v63  ;;  %v1480_v63 = vld [vmem:[#allocation10 + $0x130] sm:$0xff] }
 0x407   :  { %2305 = vmatprep.subr.bf16.mxu1 %v2671_v0  ;;  %v2656_v0 = vcombine.low %v1468_v58, %v1472_v59  ;;  %v2665_v1 = vcombine.high %v1476_v62, %v1480_v63 }
 0x40a   :  { %2306 = vmatpush1.bf16.msra.mxu1 %v2670_v3  ;;  %v1488_v3 = vld [vmem:[#allocation10 + $0x170] sm:$0xff] }
 0x40b   :  { %2307 = vmatprep.subr.bf16.mxu1 %v2679_v4  ;;  %v2664_v4 = vcombine.low %v1476_v62, %v1480_v63 }
 0x40e   :  { %2308 = vmatpush1.bf16.msra.mxu1 %v2678_v10  ;;  %v2672_v10 = vcombine.low %v1484_v2, %v1488_v3 }
 0x40f   :  { %2309 = vmatprep.subr.bf16.mxu1 %v2687_v11  ;;  %v2681_v11 = vcombine.high %v1492_v5, %v1496_v9 }
 0x412   :  { %2310 = vmatpush1.bf16.msra.mxu1 %v2686_v14  ;;  %v2680_v14 = vcombine.low %v1492_v5, %v1496_v9  ;;  %v1582_v9 = vsub.s32 2, %v3336_v34 }
 0x413   :  { %2311 = vmatprep.subr.bf16.mxu1 %v2695_v15  ;;  %v2689_v15 = vcombine.high %v1500_v12, %v1504_v13 }
 0x416   :  { %2312 = vmatpush1.bf16.msra.mxu1 %v2694_v18  ;;  %v2688_v18 = vcombine.low %v1500_v12, %v1504_v13 }
 0x417   :  { %2313 = vmatprep.subr.bf16.mxu1 %v2703_v19  ;;  %v2697_v19 = vcombine.high %v1508_v16, %v1512_v17 }
 0x41a   :  { %2314 = vmatpush1.bf16.msra.mxu1 %v2702_v22  ;;  %v2696_v22 = vcombine.low %v1508_v16, %v1512_v17 }
 0x41b   :  { %2315 = vmatprep.subr.bf16.mxu1 %v2711_v23  ;;  %v2705_v23 = vcombine.high %v1516_v20, %v1520_v21 }
 0x41e   :  { %2316 = vmatpush1.bf16.msra.mxu1 %v2710_v26  ;;  %v2704_v26 = vcombine.low %v1516_v20, %v1520_v21  ;;  %v1590_v21 = vsub.s32 4, %v3336_v34 }
 0x41f   :  { %2317 = vmatprep.subr.bf16.mxu1 %v2719_v27  ;;  %v2713_v27 = vcombine.high %v1524_v24, %v1528_v25 }
 0x422   :  { %2318 = vmatpush1.bf16.msra.mxu1 %v2718_v30  ;;  %v2712_v30 = vcombine.low %v1524_v24, %v1528_v25 }
 0x423   :  { %2319 = vmatprep.subr.bf16.mxu1 %v2727_v31  ;;  %v2721_v31 = vcombine.high %v1532_v28, %v1536_v29 }
 0x426   :  { %2320 = vmatpush1.bf16.msra.mxu1 %v2726_v36  ;;  %v2720_v36 = vcombine.low %v1532_v28, %v1536_v29 }
 0x427   :  { %2321 = vmatprep.subr.bf16.mxu1 %v2735_v6  ;;  %v2729_v6 = vcombine.high %v1540_v32, %v1544_v33 }
 0x42a   :  { %2322 = vmatpush1.bf16.msra.mxu1 %v2734_v38  ;;  %v2728_v38 = vcombine.low %v1540_v32, %v1544_v33 }
 0x42b   :  { %2323 = vmatprep.subr.bf16.mxu1 %v2743_v39  ;;  %v2737_v39 = vcombine.high %v1548_v7, %v1552_v8 }
 0x42e   :  { %2324 = vmatpush1.bf16.msra.mxu1 %v2742_v42  ;;  %v2736_v42 = vcombine.low %v1548_v7, %v1552_v8 }
 0x42f   :  { %2325 = vmatprep.subr.bf16.mxu1 %v2751_v43  ;;  %v2745_v43 = vcombine.high %v1556_v40, %v1560_v41 }
 0x432   :  { %2326 = vmatpush1.bf16.msra.mxu1 %v2750_v48  ;;  %v2744_v48 = vcombine.low %v1556_v40, %v1560_v41 }
 0x433   :  { %2338 = vmatprep.subr.bf16.mxu1 %v2633_v49  ;;  %v2753_v49 = vcombine.high %v1564_v44, %v1568_v45 }
 0x435   :  { %2328 = vmatmul.mubr.bf16.vlgmr.msra.gmra.mrb[12].mxu1 %v3368_v46 }
 0x436   :  { %2339 = vmatpush1.bf16.msra.mxu1 %v2632_v52  ;;  %2370 = vmatprep.mubr.bf16.mxu1 %v3370_v47  ;;  %v2673_v47 = vcombine.high %v1484_v2, %v1488_v3  ;;  %v1570_v52 = vld [vmem:[%s3412_s8] sm:$0xff]  ;;  %s3192_s8 = smov [#allocation11]  }
 0x437   :  { %2340 = vmatprep.subr.bf16.mxu1 %v2641_v53  ;;  %v1602_v53 = vsub.s32 7, %v3336_v34  ;;  %v1575_v54 = vrot.slane %v1570_v52, %v3339_v35  ;;  %v1599_v55 = vrot.slane %v1570_v52, %v1598_v51  ;;  %s2445_s12 = sshll.u32 %s3192_s8, 4  ;;  %s2446_s12 = int_to_ptr.vmem [resolvable:$true] %s2445_s12 }
 0x438   :  { %s3150_s13 = scalar_lea.vmem %s2446_s12, 2048  ;;  %p3155_p13 = scmp.lt.s32.totalorder %s2446_s12, %s2446_s12 }
 0x439   :  { %p3151_p12 = scmp.ne.s32.totalorder %s2446_s12, %s3150_s13  ;;  %p3156_p0 = scmp.lt.s32.totalorder %s3150_s13, %s3150_s13 }
 0x43a   :  { %2341 = vmatpush1.bf16.msra.mxu1 %v2640_v56  ;;  %v1579_v56 = vrot.slane %v1570_v52, %v3345_v37 }
 0x43b   :  { %2342 = vmatprep.subr.bf16.mxu1 %v2649_v57  ;;  %v1603_v57 = vrot.slane %v1570_v52, %v1602_v53  ;;  %p3157_p1 = por %p3156_p0, %p3155_p13 }
 0x43d   :  { %p3158_p2 = pnand %p3157_p1, %p3151_p12 }
 0x43e   :  { %2343 = vmatpush1.bf16.msra.mxu1 %v2648_v60 }
 0x43f   :  { %2344 = vmatprep.subr.bf16.mxu1 %v2657_v61 }
 0x442   :  { %2345 = vmatpush1.bf16.msra.mxu1 %v2656_v0 }
 0x443   :  { %2346 = vmatprep.subr.bf16.mxu1 %v2665_v1 }
 0x446   :  { %2347 = vmatpush1.bf16.msra.mxu1 %v2664_v4 }
 0x447   :  { %2348 = vmatprep.subr.bf16.mxu1 %v2673_v47 }
 0x44a   :  { %2349 = vmatpush1.bf16.msra.mxu1 %v2672_v10  ;;  %v1586_v10 = vsub.s32 3, %v3336_v34 }
 0x44b   :  { %2350 = vmatprep.subr.bf16.mxu1 %v2681_v11  ;;  %v1583_v11 = vrot.slane %v1570_v52, %v1582_v9 }
 0x44c   :  { %v1587_v12 = vrot.slane %v1570_v52, %v1586_v10 }
 0x44e   :  { %2351 = vmatpush1.bf16.msra.mxu1 %v2680_v14 }
 0x44f   :  { %2352 = vmatprep.subr.bf16.mxu1 %v2689_v15 }
 0x452   :  { %2353 = vmatpush1.bf16.msra.mxu1 %v2688_v18 }
 0x453   :  { %2354 = vmatprep.subr.bf16.mxu1 %v2697_v19 }
 0x456   :  { %2355 = vmatpush1.bf16.msra.mxu1 %v2696_v22  ;;  %v1594_v22 = vsub.s32 5, %v3336_v34 }
 0x457   :  { %2356 = vmatprep.subr.bf16.mxu1 %v2705_v23  ;;  %v1591_v23 = vrot.slane %v1570_v52, %v1590_v21 }
 0x458   :  { %v1595_v24 = vrot.slane %v1570_v52, %v1594_v22 }
 0x45a   :  { %2357 = vmatpush1.bf16.msra.mxu1 %v2704_v26 }
 0x45b   :  { %2358 = vmatprep.subr.bf16.mxu1 %v2713_v27 }
 0x45e   :  { %2359 = vmatpush1.bf16.msra.mxu1 %v2712_v30 }
 0x45f   :  { %2360 = vmatprep.subr.bf16.mxu1 %v2721_v31 }
 0x462   :  { %2361 = vmatpush1.bf16.msra.mxu1 %v2720_v36 }
 0x463   :  { %2362 = vmatprep.subr.bf16.mxu1 %v2729_v6 }
 0x466   :  { %2363 = vmatpush1.bf16.msra.mxu1 %v2728_v38 }
 0x467   :  { %2364 = vmatprep.subr.bf16.mxu1 %v2737_v39 }
 0x46a   :  { %2365 = vmatpush1.bf16.msra.mxu1 %v2736_v42 }
 0x46b   :  { %2366 = vmatprep.subr.bf16.mxu1 %v2745_v43 }
 0x46e   :  { %2367 = vmatpush1.bf16.msra.mxu1 %v2744_v48 }
 0x46f   :  { %2368 = vmatprep.subr.bf16.mxu1 %v2753_v49 }
 0x472   :  { %2369 = vmatpush1.bf16.msra.mxu1 %v2752_v50 }
 0x475   :  { %2371 = vmatmul.mubr.bf16.vlgmr.msra.gmra.mrb[16].mxu1 %v3368_v46 }
 0x4c8   :  { %v2286_v58 = vpop.f32.mrb[8].mxu1  ;;  %v2415_v59 = vpop.f32.mrb[4].mxu0 }
 0x4c9   :  { %v2287_v60 = vadd.f32 %v2286_v58, %v1575_v54  ;;  %v2416_v61 = vadd.f32 %v2415_v59, %v1599_v55  ;;  %v2288_v62 = vpop.f32.mrb[9].mxu1  ;;  %v2417_v46 = vpop.f32.mrb[5].mxu0 }
 0x4ca   :  { %v2289_v63 = vadd.f32 %v2288_v62, %v1579_v56  ;;  %v2418_v0 = vadd.f32 %v2417_v46, %v1603_v57  ;;  %v2290_v1 = vpop.f32.mrb[10].mxu1  ;;  %v2419_v2 = vpop.f32.mrb[6].mxu0 }
 0x4cb   :  { %2424 = vst [vmem:[#allocation11] sm:$0xff] %v2287_v60  ;;  %2430 = vst [vmem:[#allocation11 + $0x30] sm:$0xff] %v2416_v61  ;;  %v2291_v3 = vadd.f32 %v2290_v1, %v1575_v54  ;;  %v2420_v4 = vadd.f32 %v2419_v2, %v1599_v55  ;;  %v2292_v47 = vpop.f32.mrb[11].mxu1  ;;  %v2421_v35 = vpop.f32.mrb[7].mxu0 }
 0x4cc   :  { %2425 = vst [vmem:[#allocation11 + $0x8] sm:$0xff] %v2289_v63  ;;  %2431 = vst [vmem:[#allocation11 + $0x38] sm:$0xff] %v2418_v0  ;;  %v2293_v37 = vadd.f32 %v2292_v47, %v1579_v56  ;;  %v2422_v5 = vadd.f32 %v2421_v35, %v1603_v57 }
 0x4cd   :  { %2432 = vst [vmem:[#allocation11 + $0x40] sm:$0xff] %v2291_v3  ;;  %2438 = vst [vmem:[#allocation11 + $0x70] sm:$0xff] %v2420_v4 }
 0x4ce   :  { %2433 = vst [vmem:[#allocation11 + $0x48] sm:$0xff] %v2293_v37  ;;  %2439 = vst [vmem:[#allocation11 + $0x78] sm:$0xff] %v2422_v5 }
 0x508   :  { %v2329_v13 = vpop.f32.mrb[12].mxu1 }
 0x509   :  { %v2330_v14 = vadd.f32 %v2329_v13, %v1583_v11  ;;  %v2331_v15 = vpop.f32.mrb[13].mxu1 }
 0x50a   :  { %v2332_v16 = vadd.f32 %v2331_v15, %v1587_v12  ;;  %v2333_v17 = vpop.f32.mrb[14].mxu1 }
 0x50b   :  { %2426 = vst [vmem:[#allocation11 + $0x10] sm:$0xff] %v2330_v14  ;;  %v2334_v18 = vadd.f32 %v2333_v17, %v1583_v11  ;;  %v2335_v19 = vpop.f32.mrb[15].mxu1 }
 0x50c   :  { %2427 = vst [vmem:[#allocation11 + $0x18] sm:$0xff] %v2332_v16  ;;  %v2336_v20 = vadd.f32 %v2335_v19, %v1587_v12 }
 0x50d   :  { %2434 = vst [vmem:[#allocation11 + $0x50] sm:$0xff] %v2334_v18 }
 0x50e   :  { %2435 = vst [vmem:[#allocation11 + $0x58] sm:$0xff] %v2336_v20 }
 0x548   :  { %v2372_v25 = vpop.f32.mrb[16].mxu1 }
 0x549   :  { %v2373_v26 = vadd.f32 %v2372_v25, %v1591_v23  ;;  %v2374_v27 = vpop.f32.mrb[17].mxu1 }
 0x54a   :  { %v2375_v28 = vadd.f32 %v2374_v27, %v1595_v24  ;;  %v2376_v29 = vpop.f32.mrb[18].mxu1 }
 0x54b   :  { %2428 = vst [vmem:[#allocation11 + $0x20] sm:$0xff] %v2373_v26  ;;  %v2377_v30 = vadd.f32 %v2376_v29, %v1591_v23  ;;  %v2378_v31 = vpop.f32.mrb[19].mxu1 }
 0x54c   :  { %2429 = vst [vmem:[#allocation11 + $0x28] sm:$0xff] %v2375_v28  ;;  %v2379_v32 = vadd.f32 %v2378_v31, %v1595_v24 }
 0x54d   :  { %2436 = vst [vmem:[#allocation11 + $0x60] sm:$0xff] %v2377_v30 }
 0x54e   :  { %2437 = vst [vmem:[#allocation11 + $0x68] sm:$0xff] %v2379_v32 }
 0x54f   :  { %3161 = shalt.err (!%p3158_p2)
}
 0x550   :  { %s3162_s14 = scalar_lea.hbm %s3413_s9, 2048 }
 0x551   :  { %p3163_p3 = scmp.ne.s32.totalorder %s3413_s9, %s3162_s14  ;;  %p3166_p4 = scmp.lt.u32.totalorder %s3162_s14, %s3413_s9 }
 0x553   :  { %p3168_p5 = pnand %p3166_p4, %p3163_p3 }
 0x555   :  { %3171 = shalt.err (!%p3168_p5)
}
 0x556   :  { %s3193_s18 = smov 1024  }
 0x557   :  { %2451 = dma.vmem_to_hbm [thread:$0]  %s2446_s12, 2048, %s3413_s9, [#allocation4], %s3193_s18, %s3193_s18, %s3188_s0  }
 0x558   :  { %3178 = dma.done.wait [#allocation4], 2048  }
 0x559   :  { %3179 = vsyncadd [#allocation4], 4294965248 }
 0x55a   :  { %2455 = vsyncpa [#allocation3], 1 }
 0x55b   :  { %2456 = vsyncpa [#allocation6], 1 }
 0x55c   :  { %2457 = vsyncpa [#allocation9], 1 }
 0x55d   :  { %2458 = vsyncpa [#allocation4], 1 }

</bundles_post_ra>
